<compile_context>
chip_gen: v7x
topology: tpu7x:2x2x1
jax: 0.10.0
libtpu: 0.0.40
codegen_flags: <defaults>
</compile_context>

<pallas_src>
import functools

import jax
import jax.numpy as jnp
from jax.experimental import pallas as pl
from jax.experimental.pallas import tpu as pltpu

EPS = 1e-5
LANE = 128        # channel padding target (TPU lane width)
ROW_ALIGN = 16    # node-row padding (bf16 sublane-packing friendly)


def _round_up(x, m):
    return (x + m - 1) // m * m


def _pad2(a, rows, cols):
    return jnp.pad(a, ((0, rows - a.shape[0]), (0, cols - a.shape[1])))


def _pad_vec(v, n):
    return jnp.pad(v, (0, n - v.shape[0]))


# ---------------------------------------------------------------------------
# Fused kernel
# ---------------------------------------------------------------------------
def _mxu(a, b):
    """MXU matmul: bf16 operands, f32 accumulation."""
    return jnp.dot(a.astype(jnp.bfloat16), b.astype(jnp.bfloat16),
                   preferred_element_type=jnp.float32)


def _bn_rows(x, gamma, beta):
    """BatchNorm1d (training mode, biased variance) over axis 0 (no masking)."""
    mean = jnp.mean(x, axis=0, keepdims=True)
    diff = x - mean
    var = jnp.mean(diff * diff, axis=0, keepdims=True)
    return diff * jax.lax.rsqrt(var + EPS) * gamma + beta


def resgcn_fused_kernel(
    x0_ref, a_ref, w_ref, b_ref, g_ref, be_ref, pool_ref,
    gfc_ref, bfc_ref, wfc_ref, biasfc_ref,
    gh_ref, bh_ref, wcls_ref, biascls_ref,
    out_ref, h_ref,
    *, n_real, num_classes, num_layers):
    l = pl.program_id(0)
    n_pad = h_ref.shape[0]

    @pl.when(l == 0)
    def _():
        h_ref[...] = x0_ref[...]                 # layer 0 consumes padded x
        out_ref[...] = jnp.zeros_like(out_ref)   # hygiene: defined before final write

    # Row mask: exclude zero-padded node rows from the BatchNorm statistics
    # (keeps the *global* batch stats of the unpadded module).
    row = jax.lax.broadcasted_iota(jnp.int32, (n_pad, 1), 0)
    mask = (row < n_real).astype(jnp.float32)
    inv_n = 1.0 / float(n_real)

    # ---- BN (training mode, masked batch stats) -> GCNConv -> ReLU --------
    x = h_ref[...]                               # (N_pad, 128), f32
    gamma = g_ref[...]                           # (1, 128)
    beta = be_ref[...]
    bias = b_ref[...]
    mean = jnp.sum(x * mask, axis=0, keepdims=True) * inv_n
    diff = x - mean
    var = jnp.sum(diff * diff * mask, axis=0, keepdims=True) * inv_n
    xn = diff * jax.lax.rsqrt(var + EPS) * gamma + beta

    xw = _mxu(xn, w_ref[...])                    # (N_pad, 128) small matmul
    ax = jnp.dot(a_ref[...], xw.astype(jnp.bfloat16),
                 preferred_element_type=jnp.float32)   # big matmul, A_hat resident bf16
    h_new = jnp.maximum(ax + bias, 0.0) * mask   # zero padded rows for next layer
    h_ref[...] = h_new

    # ---- last layer: fused global_add_pool + FC head + classifier ---------
    @pl.when(l == num_layers - 1)
    def _():
        pooled = _mxu(pool_ref[...], h_new)      # (G, 128)  global_add_pool
        # num_fc_layers - 1 == 1:   BN -> Linear -> ReLU
        t = _bn_rows(pooled, gfc_ref[...], bfc_ref[...])
        t = jnp.maximum(_mxu(t, wfc_ref[...]) + biasfc_ref[...], 0.0)
        # bn_hidden -> lin_class -> log_softmax
        t = _bn_rows(t, gh_ref[...], bh_ref[...])
        logits = _mxu(t, wcls_ref[...]) + biascls_ref[...]
        col = jax.lax.broadcasted_iota(jnp.int32, logits.shape, 1)
        logits = jnp.where(col < num_classes, logits, -1e30)   # mask padded classes
        mx = jnp.max(logits, axis=-1, keepdims=True)
        s = logits - mx
        lse = jnp.log(jnp.sum(jnp.exp(s), axis=-1, keepdims=True))
        out_ref[...] = s - lse


# ---------------------------------------------------------------------------
# pallas_call wrapper
# ---------------------------------------------------------------------------
def resgcn_forward(pp, x_pad, a_hat_bf16, pool_pad, *, n_real, num_classes):
    n_pad, hp = x_pad.shape
    g = pool_pad.shape[0]
    num_layers = pp["w_stack"].shape[0]

    kernel = functools.partial(
        resgcn_fused_kernel,
        n_real=n_real, num_classes=num_classes, num_layers=num_layers)

    def resident(shape):
        # constant block index across the layer axis -> DMA'd once, stays in VMEM
        return pl.BlockSpec(shape, lambda l, _nd=len(shape): (0,) * _nd)

    def per_layer(shape):
        # leading (layer) axis squeezed; streamed/pipelined per grid step
        return pl.BlockSpec((None,) + shape,
                            lambda l, _nd=len(shape): (l,) + (0,) * _nd)

    in_specs = [
        resident((n_pad, hp)),            # x (padded input features)
        resident((n_pad, n_pad)),         # A_hat (bf16), resident across layers
        per_layer((hp, hp)),              # stacked conv weights   (L, hp, hp)
        per_layer((1, hp)),               # stacked conv biases    (L, 1, hp)
        per_layer((1, hp)),               # stacked BN gammas      (L, 1, hp)
        per_layer((1, hp)),               # stacked BN betas       (L, 1, hp)
        resident((g, n_pad)),             # pooling matrix
        resident((1, hp)), resident((1, hp)),    # bn_fc gamma / beta
        resident((hp, hp)), resident((1, hp)),   # lin0 W / b
        resident((1, hp)), resident((1, hp)),    # bn_hidden gamma / beta
        resident((hp, hp)), resident((1, hp)),   # lin_class W / b
    ]
    out_specs = pl.BlockSpec((g, hp), lambda l: (0, 0))   # lane-dense (G, 128)

    # Explicit VMEM budget: resident blocks + double-buffered streamed blocks
    # + activation scratch, 2x headroom, capped under v7x's 64 MiB physical.
    resident_bytes = (n_pad * hp * 4          # x
                      + n_pad * n_pad * 2     # A_hat (bf16)
                      + g * n_pad * 4         # pool
                      + 2 * hp * hp * 4       # lin0 / lin_class weights
                      + 6 * hp * 4            # head vectors
                      + g * hp * 4            # output
                      + n_pad * hp * 4)       # h scratch
    streamed_bytes = 2 * (hp * hp * 4 + 3 * hp * 4)
    vmem_limit = int(min(48 * 1024 * 1024,
                         max(8 * 1024 * 1024,
                             2 * (resident_bytes + streamed_bytes))))

    return pl.pallas_call(
        kernel,
        out_shape=jax.ShapeDtypeStruct((g, hp), jnp.float32),
        grid=(num_layers,),
        in_specs=in_specs,
        out_specs=out_specs,
        scratch_shapes=[pltpu.VMEM((n_pad, hp), jnp.float32)],
        compiler_params=pltpu.CompilerParams(
            # Layer axis is a true sequential dependency -> "arbitrary".
            dimension_semantics=("arbitrary",),
            vmem_limit_bytes=vmem_limit,
        ),
    )(x_pad, a_hat_bf16,
      pp["w_stack"], pp["b_stack"], pp["g_stack"], pp["beta_stack"],
      pool_pad,
      pp["g_fc"], pp["b_fc"], pp["w_fc"], pp["bias_fc"],
      pp["g_h"], pp["b_h"], pp["w_cls"], pp["bias_cls"])


# ---------------------------------------------------------------------------
# Graph glue (plain JAX): dense normalized adjacency + pooling matrix
# ---------------------------------------------------------------------------
def build_norm_adj(edge_index, num_nodes):
    src, dst = edge_index
    a = jnp.zeros((num_nodes, num_nodes), jnp.float32)
    a = a.at[dst, src].set(1.0)
    a = a.at[src, dst].set(1.0)                      # treat graph as undirected
    a = a + jnp.eye(num_nodes, dtype=jnp.float32)    # add self loops
    deg = jnp.sum(a, axis=1)
    dinv = jax.lax.rsqrt(deg)
    return a * dinv[:, None] * dinv[None, :]         # D^-1/2 (A+I) D^-1/2


def build_pool_matrix(batch, num_graphs):
    return jax.nn.one_hot(batch, num_graphs, dtype=jnp.float32).T   # (G, N)


# ---------------------------------------------------------------------------
# Pure-JAX reference (mirrors the kernel's bf16-operand / f32-accumulate MXU)
# ---------------------------------------------------------------------------
def resgcn_ref(p, x, a_hat, pool):
    h = _bn_rows(x, p["bn_feat_g"], p["bn_feat_b"])
    h = jnp.maximum(_mxu(a_hat, _mxu(h, p["conv_feat_w"])) + p["conv_feat_b"], 0.0)
    for i in range(3):
        t = _bn_rows(h, p[f"bn_conv{i}_g"], p[f"bn_conv{i}_b"])
        h = jnp.maximum(_mxu(a_hat, _mxu(t, p[f"conv{i}_w"])) + p[f"conv{i}_b"], 0.0)
    pooled = _mxu(pool, h)
    t = _bn_rows(pooled, p["bn_fc0_g"], p["bn_fc0_b"])
    t = jnp.maximum(_mxu(t, p["lin0_w"]) + p["lin0_b"], 0.0)
    t = _bn_rows(t, p["bn_hidden_g"], p["bn_hidden_b"])
    logits = _mxu(t, p["lin_class_w"]) + p["lin_class_b"]
    mx = jnp.max(logits, axis=-1, keepdims=True)
    s = logits - mx
    return s - jnp.log(jnp.sum(jnp.exp(s), axis=-1, keepdims=True))


# ---------------------------------------------------------------------------
# Parameters (logical shapes) + padding/stacking for the kernel
# ---------------------------------------------------------------------------
def init_params(key, nfeat, hidden, num_classes):
    ks = jax.random.split(key, 12)
    p = {}
    p["conv_feat_w"] = 0.2 * jax.random.normal(ks[0], (nfeat, hidden), jnp.float32)
    p["conv_feat_b"] = 0.1 * jax.random.normal(ks[1], (hidden,), jnp.float32)
    for i in range(3):
        p[f"conv{i}_w"] = 0.2 * jax.random.normal(ks[2 + i], (hidden, hidden), jnp.float32)
        p[f"conv{i}_b"] = 0.1 * jax.random.normal(ks[5 + i], (hidden,), jnp.float32)
    p["lin0_w"] = 0.2 * jax.random.normal(ks[8], (hidden, hidden), jnp.float32)
    p["lin0_b"] = 0.1 * jax.random.normal(ks[9], (hidden,), jnp.float32)
    p["lin_class_w"] = 0.2 * jax.random.normal(ks[10], (hidden, num_classes), jnp.float32)
    p["lin_class_b"] = 0.1 * jax.random.normal(ks[11], (num_classes,), jnp.float32)
    # BatchNorm1d init: nn.init.constant_(weight, 1), constant_(bias, 1e-4)
    p["bn_feat_g"] = jnp.ones((nfeat,), jnp.float32)
    p["bn_feat_b"] = jnp.full((nfeat,), 1e-4, jnp.float32)
    for i in range(3):
        p[f"bn_conv{i}_g"] = jnp.ones((hidden,), jnp.float32)
        p[f"bn_conv{i}_b"] = jnp.full((hidden,), 1e-4, jnp.float32)
    p["bn_fc0_g"] = jnp.ones((hidden,), jnp.float32)
    p["bn_fc0_b"] = jnp.full((hidden,), 1e-4, jnp.float32)
    p["bn_hidden_g"] = jnp.ones((hidden,), jnp.float32)
    p["bn_hidden_b"] = jnp.full((hidden,), 1e-4, jnp.float32)
    return p


def pad_params(p, hp):
    """Zero-pad everything to the 128-lane width and stack per-layer params."""
    pw = lambda w: _pad2(w, hp, hp)
    pv = lambda v: _pad_vec(v, hp)
    w_stack = jnp.stack([pw(p["conv_feat_w"])] +
                        [pw(p[f"conv{i}_w"]) for i in range(3)])                 # (4,hp,hp)
    b_stack = jnp.stack([pv(p["conv_feat_b"])] +
                        [pv(p[f"conv{i}_b"]) for i in range(3)])[:, None, :]     # (4,1,hp)
    g_stack = jnp.stack([pv(p["bn_feat_g"])] +
                        [pv(p[f"bn_conv{i}_g"]) for i in range(3)])[:, None, :]
    beta_stack = jnp.stack([pv(p["bn_feat_b"])] +
                           [pv(p[f"bn_conv{i}_b"]) for i in range(3)])[:, None, :]
    return {
        "w_stack": w_stack, "b_stack": b_stack,
        "g_stack": g_stack, "beta_stack": beta_stack,
        "g_fc": pv(p["bn_fc0_g"])[None, :], "b_fc": pv(p["bn_fc0_b"])[None, :],
        "w_fc": pw(p["lin0_w"]), "bias_fc": pv(p["lin0_b"])[None, :],
        "g_h": pv(p["bn_hidden_g"])[None, :], "b_h": pv(p["bn_hidden_b"])[None, :],
        "w_cls": pw(p["lin_class_w"]), "bias_cls": pv(p["lin_class_b"])[None, :],
    }


if __name__ == "__main__":
    # Small synthetic graph batch: 2 graphs, 8 nodes each, ring topology.
    nfeat, hidden = 8, 32
    label_num = [0, 1, 2, 3]
    num_classes = max(label_num) + 1
    nodes_per_graph, num_graphs = 8, 2
    N = nodes_per_graph * num_graphs

    key = jax.random.PRNGKey(0)
    k_x, k_p = jax.random.split(key)

    x = jax.random.normal(k_x, (N, nfeat), jnp.float32)
    batch = jnp.repeat(jnp.arange(num_graphs, dtype=jnp.int32), nodes_per_graph)

    src_list, dst_list = [], []
    for gi in range(num_graphs):
        base = gi * nodes_per_graph
        for i in range(nodes_per_graph):
            src_list.append(base + i)
            dst_list.append(base + (i + 1) % nodes_per_graph)
    edge_index = jnp.array([src_list, dst_list], dtype=jnp.int32)

    a_hat = build_norm_adj(edge_index, N)
    pool = build_pool_matrix(batch, num_graphs)
    params = init_params(k_p, nfeat, hidden, num_classes)

    # --- pad / pack for the fused kernel ------------------------------------
    n_pad = _round_up(N, ROW_ALIGN)
    x_pad = _pad2(x, n_pad, LANE)
    a_pad = _pad2(a_hat, n_pad, n_pad).astype(jnp.bfloat16)
    pool_pad = _pad2(pool, num_graphs, n_pad)
    pparams = pad_params(params, LANE)

    fwd = jax.jit(functools.partial(resgcn_forward,
                                    n_real=N, num_classes=num_classes))
    out_pad = jax.block_until_ready(fwd(pparams, x_pad, a_pad, pool_pad))
    out = out_pad[:, :num_classes]

    ref = resgcn_ref(params, x, a_hat, pool)
    assert out.shape == (num_graphs, num_classes)
    assert jnp.allclose(out, ref, atol=2e-3, rtol=2e-3), (out, ref)

    print("KERNEL_OK")
</pallas_src>

<mosaic_0001>
module attributes {stable_mosaic.version = 11 : i64} {
  func.func @resgcn_fused_kernel(%arg0: i32, %arg1: memref<16x128xf32, #tpu.memory_space<vmem>>, %arg2: memref<16x16xbf16, #tpu.memory_space<vmem>>, %arg3: memref<1x128x128xf32, #tpu.memory_space<vmem>>, %arg4: memref<1x1x128xf32, #tpu.memory_space<vmem>>, %arg5: memref<1x1x128xf32, #tpu.memory_space<vmem>>, %arg6: memref<1x1x128xf32, #tpu.memory_space<vmem>>, %arg7: memref<2x16xf32, #tpu.memory_space<vmem>>, %arg8: memref<1x128xf32, #tpu.memory_space<vmem>>, %arg9: memref<1x128xf32, #tpu.memory_space<vmem>>, %arg10: memref<128x128xf32, #tpu.memory_space<vmem>>, %arg11: memref<1x128xf32, #tpu.memory_space<vmem>>, %arg12: memref<1x128xf32, #tpu.memory_space<vmem>>, %arg13: memref<1x128xf32, #tpu.memory_space<vmem>>, %arg14: memref<128x128xf32, #tpu.memory_space<vmem>>, %arg15: memref<1x128xf32, #tpu.memory_space<vmem>>, %arg16: memref<2x128xf32, #tpu.memory_space<vmem>>, %arg17: memref<16x128xf32, #tpu.memory_space<vmem>>) attributes {dimension_semantics = [#tpu.dimension_semantics<arbitrary>], iteration_bounds = array<i64: 4>, scalar_prefetch = 0 : i64, scratch_operands = 1 : i64, tpu.core_type = #tpu.core_type<tc>, window_params = [{pipeline_mode = #tpu.pipeline_mode<synchronous>, transform_indices = @transform_0, window_bounds = array<i64: 16, 128>}, {pipeline_mode = #tpu.pipeline_mode<synchronous>, transform_indices = @transform_1, window_bounds = array<i64: 16, 16>}, {transform_indices = @transform_2, window_bounds = array<i64: 1, 128, 128>}, {transform_indices = @transform_3, window_bounds = array<i64: 1, 1, 128>}, {transform_indices = @transform_4, window_bounds = array<i64: 1, 1, 128>}, {transform_indices = @transform_5, window_bounds = array<i64: 1, 1, 128>}, {pipeline_mode = #tpu.pipeline_mode<synchronous>, transform_indices = @transform_6, window_bounds = array<i64: 2, 16>}, {pipeline_mode = #tpu.pipeline_mode<synchronous>, transform_indices = @transform_7, window_bounds = array<i64: 1, 128>}, {pipeline_mode = #tpu.pipeline_mode<synchronous>, transform_indices = @transform_8, window_bounds = array<i64: 1, 128>}, {pipeline_mode = #tpu.pipeline_mode<synchronous>, transform_indices = @transform_9, window_bounds = array<i64: 128, 128>}, {pipeline_mode = #tpu.pipeline_mode<synchronous>, transform_indices = @transform_10, window_bounds = array<i64: 1, 128>}, {pipeline_mode = #tpu.pipeline_mode<synchronous>, transform_indices = @transform_11, window_bounds = array<i64: 1, 128>}, {pipeline_mode = #tpu.pipeline_mode<synchronous>, transform_indices = @transform_12, window_bounds = array<i64: 1, 128>}, {pipeline_mode = #tpu.pipeline_mode<synchronous>, transform_indices = @transform_13, window_bounds = array<i64: 128, 128>}, {pipeline_mode = #tpu.pipeline_mode<synchronous>, transform_indices = @transform_14, window_bounds = array<i64: 1, 128>}, {pipeline_mode = #tpu.pipeline_mode<synchronous>, transform_indices = @transform_15, window_bounds = array<i64: 2, 128>}]} {
    %c0_i32 = arith.constant 0 : i32
    %0 = arith.cmpi eq, %arg0, %c0_i32 : i32
    %1 = arith.extui %0 : i1 to i32
    %c0_i32_0 = arith.constant 0 : i32
    %2 = arith.cmpi ne, %1, %c0_i32_0 : i32
    scf.if %2 {
      %c0_26 = arith.constant 0 : index
      %c0_27 = arith.constant 0 : index
      %57 = vector.load %arg1[%c0_26, %c0_27] : memref<16x128xf32, #tpu.memory_space<vmem>>, vector<16x128xf32>
      %c0_28 = arith.constant 0 : index
      %c0_29 = arith.constant 0 : index
      %58 = vector.load %arg17[%c0_28, %c0_29] : memref<16x128xf32, #tpu.memory_space<vmem>>, vector<16x128xf32>
      tpu.vector_store %arg17[%c0_28, %c0_29], %57 {strides = array<i32>} : memref<16x128xf32, #tpu.memory_space<vmem>>, vector<16x128xf32>,
      %cst_30 = arith.constant 0.000000e+00 : f32
      %59 = vector.broadcast %cst_30 : f32 to vector<2x128xf32>
      %c0_31 = arith.constant 0 : index
      %c0_32 = arith.constant 0 : index
      %60 = vector.load %arg16[%c0_31, %c0_32] : memref<2x128xf32, #tpu.memory_space<vmem>>, vector<2x128xf32>
      tpu.vector_store %arg16[%c0_31, %c0_32], %59 {strides = array<i32>} : memref<2x128xf32, #tpu.memory_space<vmem>>, vector<2x128xf32>,
    } else {
    }
    %3 = tpu.iota {dimensions = array<i32: 0>} : vector<16x1xi32>
    %c16_i32 = arith.constant 16 : i32
    %4 = vector.broadcast %c16_i32 : i32 to vector<16x1xi32>
    %5 = arith.cmpi slt, %3, %4 : vector<16x1xi32>
    %6 = arith.extui %5 : vector<16x1xi1> to vector<16x1xi32>
    %7 = arith.sitofp %6 : vector<16x1xi32> to vector<16x1xf32>
    %c0 = arith.constant 0 : index
    %c0_1 = arith.constant 0 : index
    %8 = vector.load %arg17[%c0, %c0_1] : memref<16x128xf32, #tpu.memory_space<vmem>>, vector<16x128xf32>
    %c0_2 = arith.constant 0 : index
    %c0_3 = arith.constant 0 : index
    %c0_4 = arith.constant 0 : index
    %9 = vector.load %arg5[%c0_2, %c0_3, %c0_4] : memref<1x1x128xf32, #tpu.memory_space<vmem>>, vector<1x1x128xf32>
    %10 = vector.shape_cast %9 : vector<1x1x128xf32> to vector<1x128xf32>
    %c0_5 = arith.constant 0 : index
    %c0_6 = arith.constant 0 : index
    %c0_7 = arith.constant 0 : index
    %11 = vector.load %arg6[%c0_5, %c0_6, %c0_7] : memref<1x1x128xf32, #tpu.memory_space<vmem>>, vector<1x1x128xf32>
    %12 = vector.shape_cast %11 : vector<1x1x128xf32> to vector<1x128xf32>
    %c0_8 = arith.constant 0 : index
    %c0_9 = arith.constant 0 : index
    %c0_10 = arith.constant 0 : index
    %13 = vector.load %arg4[%c0_8, %c0_9, %c0_10] : memref<1x1x128xf32, #tpu.memory_space<vmem>>, vector<1x1x128xf32>
    %14 = vector.shape_cast %13 : vector<1x1x128xf32> to vector<1x128xf32>
    %15 = vector.broadcast %7 : vector<16x1xf32> to vector<16x128xf32>
    %16 = arith.mulf %8, %15 : vector<16x128xf32>
    %cst = arith.constant dense<0.000000e+00> : vector<128xf32>
    %17 = vector.multi_reduction <add>, %16, %cst [0] : vector<16x128xf32> to vector<128xf32>
    %18 = vector.shape_cast %17 : vector<128xf32> to vector<1x128xf32>
    %cst_11 = arith.constant 6.250000e-02 : f32
    %19 = vector.broadcast %cst_11 : f32 to vector<1x128xf32>
    %20 = arith.mulf %18, %19 : vector<1x128xf32>
    %21 = vector.broadcast %20 : vector<1x128xf32> to vector<16x128xf32>
    %22 = arith.subf %8, %21 : vector<16x128xf32>
    %23 = arith.mulf %22, %22 : vector<16x128xf32>
    %24 = vector.broadcast %7 : vector<16x1xf32> to vector<16x128xf32>
    %25 = arith.mulf %23, %24 : vector<16x128xf32>
    %cst_12 = arith.constant dense<0.000000e+00> : vector<128xf32>
    %26 = vector.multi_reduction <add>, %25, %cst_12 [0] : vector<16x128xf32> to vector<128xf32>
    %27 = vector.shape_cast %26 : vector<128xf32> to vector<1x128xf32>
    %cst_13 = arith.constant 6.250000e-02 : f32
    %28 = vector.broadcast %cst_13 : f32 to vector<1x128xf32>
    %29 = arith.mulf %27, %28 : vector<1x128xf32>
    %cst_14 = arith.constant 9.99999974E-6 : f32
    %30 = vector.broadcast %cst_14 : f32 to vector<1x128xf32>
    %31 = arith.addf %29, %30 : vector<1x128xf32>
    %32 = math.rsqrt %31 : vector<1x128xf32>
    %33 = vector.broadcast %32 : vector<1x128xf32> to vector<16x128xf32>
    %34 = arith.mulf %22, %33 : vector<16x128xf32>
    %35 = vector.broadcast %10 : vector<1x128xf32> to vector<16x128xf32>
    %36 = arith.mulf %34, %35 : vector<16x128xf32>
    %37 = vector.broadcast %12 : vector<1x128xf32> to vector<16x128xf32>
    %38 = arith.addf %36, %37 : vector<16x128xf32>
    %c0_15 = arith.constant 0 : index
    %c0_16 = arith.constant 0 : index
    %c0_17 = arith.constant 0 : index
    %39 = vector.load %arg3[%c0_15, %c0_16, %c0_17] : memref<1x128x128xf32, #tpu.memory_space<vmem>>, vector<1x128x128xf32>
    %40 = vector.shape_cast %39 : vector<1x128x128xf32> to vector<128x128xf32>
    %41 = arith.truncf %38 : vector<16x128xf32> to vector<16x128xbf16>
    %42 = arith.truncf %40 : vector<128x128xf32> to vector<128x128xbf16>
    %cst_18 = arith.constant dense<0.000000e+00> : vector<16x128xf32>
    %43 = tpu.matmul %41, %42, %cst_18 {dimension_numbers = #tpu.dot_dimension_numbers<[1], [0], [0], [1], [0, 0, 1, 1], [], []>} : vector<16x128xbf16>, vector<128x128xbf16>, vector<16x128xf32> -> vector<16x128xf32>
    %c0_19 = arith.constant 0 : index
    %c0_20 = arith.constant 0 : index
    %44 = vector.load %arg2[%c0_19, %c0_20] : memref<16x16xbf16, #tpu.memory_space<vmem>>, vector<16x16xbf16>
    %45 = arith.truncf %43 : vector<16x128xf32> to vector<16x128xbf16>
    %cst_21 = arith.constant dense<0.000000e+00> : vector<16x128xf32>
    %46 = tpu.matmul %44, %45, %cst_21 {dimension_numbers = #tpu.dot_dimension_numbers<[1], [0], [0], [1], [0, 0, 1, 1], [], []>} : vector<16x16xbf16>, vector<16x128xbf16>, vector<16x128xf32> -> vector<16x128xf32>
    %47 = vector.broadcast %14 : vector<1x128xf32> to vector<16x128xf32>
    %48 = arith.addf %46, %47 : vector<16x128xf32>
    %cst_22 = arith.constant 0.000000e+00 : f32
    %49 = vector.broadcast %cst_22 : f32 to vector<16x128xf32>
    %50 = arith.maximumf %48, %49 : vector<16x128xf32>
    %51 = vector.broadcast %7 : vector<16x1xf32> to vector<16x128xf32>
    %52 = arith.mulf %50, %51 : vector<16x128xf32>
    %c0_23 = arith.constant 0 : index
    %c0_24 = arith.constant 0 : index
    %53 = vector.load %arg17[%c0_23, %c0_24] : memref<16x128xf32, #tpu.memory_space<vmem>>, vector<16x128xf32>
    tpu.vector_store %arg17[%c0_23, %c0_24], %52 {strides = array<i32>} : memref<16x128xf32, #tpu.memory_space<vmem>>, vector<16x128xf32>,
    %c3_i32 = arith.constant 3 : i32
    %54 = arith.cmpi eq, %arg0, %c3_i32 : i32
    %55 = arith.extui %54 : i1 to i32
    %c0_i32_25 = arith.constant 0 : i32
    %56 = arith.cmpi ne, %55, %c0_i32_25 : i32
    scf.if %56 {
      %c0_26 = arith.constant 0 : index
      %c0_27 = arith.constant 0 : index
      %57 = vector.load %arg7[%c0_26, %c0_27] : memref<2x16xf32, #tpu.memory_space<vmem>>, vector<2x16xf32>
      %58 = arith.truncf %57 : vector<2x16xf32> to vector<2x16xbf16>
      %59 = arith.truncf %52 : vector<16x128xf32> to vector<16x128xbf16>
      %cst_28 = arith.constant dense<0.000000e+00> : vector<2x128xf32>
      %60 = tpu.matmul %58, %59, %cst_28 {dimension_numbers = #tpu.dot_dimension_numbers<[1], [0], [0], [1], [0, 0, 1, 1], [], []>} : vector<2x16xbf16>, vector<16x128xbf16>, vector<2x128xf32> -> vector<2x128xf32>
      %c0_29 = arith.constant 0 : index
      %c0_30 = arith.constant 0 : index
      %61 = vector.load %arg8[%c0_29, %c0_30] : memref<1x128xf32, #tpu.memory_space<vmem>>, vector<1x128xf32>
      %c0_31 = arith.constant 0 : index
      %c0_32 = arith.constant 0 : index
      %62 = vector.load %arg9[%c0_31, %c0_32] : memref<1x128xf32, #tpu.memory_space<vmem>>, vector<1x128xf32>
      %cst_33 = arith.constant dense<0.000000e+00> : vector<128xf32>
      %63 = vector.multi_reduction <add>, %60, %cst_33 [0] : vector<2x128xf32> to vector<128xf32>
      %64 = vector.shape_cast %63 : vector<128xf32> to vector<1x128xf32>
      %cst_34 = arith.constant 2.000000e+00 : f32
      %65 = vector.broadcast %cst_34 : f32 to vector<1x128xf32>
      %66 = arith.divf %64, %65 : vector<1x128xf32>
      %67 = vector.broadcast %66 : vector<1x128xf32> to vector<2x128xf32>
      %68 = arith.subf %60, %67 : vector<2x128xf32>
      %69 = arith.mulf %68, %68 : vector<2x128xf32>
      %cst_35 = arith.constant dense<0.000000e+00> : vector<128xf32>
      %70 = vector.multi_reduction <add>, %69, %cst_35 [0] : vector<2x128xf32> to vector<128xf32>
      %71 = vector.shape_cast %70 : vector<128xf32> to vector<1x128xf32>
      %cst_36 = arith.constant 2.000000e+00 : f32
      %72 = vector.broadcast %cst_36 : f32 to vector<1x128xf32>
      %73 = arith.divf %71, %72 : vector<1x128xf32>
      %cst_37 = arith.constant 9.99999974E-6 : f32
      %74 = vector.broadcast %cst_37 : f32 to vector<1x128xf32>
      %75 = arith.addf %73, %74 : vector<1x128xf32>
      %76 = math.rsqrt %75 : vector<1x128xf32>
      %77 = vector.broadcast %76 : vector<1x128xf32> to vector<2x128xf32>
      %78 = arith.mulf %68, %77 : vector<2x128xf32>
      %79 = vector.broadcast %61 : vector<1x128xf32> to vector<2x128xf32>
      %80 = arith.mulf %78, %79 : vector<2x128xf32>
      %81 = vector.broadcast %62 : vector<1x128xf32> to vector<2x128xf32>
      %82 = arith.addf %80, %81 : vector<2x128xf32>
      %c0_38 = arith.constant 0 : index
      %c0_39 = arith.constant 0 : index
      %83 = vector.load %arg10[%c0_38, %c0_39] : memref<128x128xf32, #tpu.memory_space<vmem>>, vector<128x128xf32>
      %84 = arith.truncf %82 : vector<2x128xf32> to vector<2x128xbf16>
      %85 = arith.truncf %83 : vector<128x128xf32> to vector<128x128xbf16>
      %cst_40 = arith.constant dense<0.000000e+00> : vector<2x128xf32>
      %86 = tpu.matmul %84, %85, %cst_40 {dimension_numbers = #tpu.dot_dimension_numbers<[1], [0], [0], [1], [0, 0, 1, 1], [], []>} : vector<2x128xbf16>, vector<128x128xbf16>, vector<2x128xf32> -> vector<2x128xf32>
      %c0_41 = arith.constant 0 : index
      %c0_42 = arith.constant 0 : index
      %87 = vector.load %arg11[%c0_41, %c0_42] : memref<1x128xf32, #tpu.memory_space<vmem>>, vector<1x128xf32>
      %88 = vector.broadcast %87 : vector<1x128xf32> to vector<2x128xf32>
      %89 = arith.addf %86, %88 : vector<2x128xf32>
      %cst_43 = arith.constant 0.000000e+00 : f32
      %90 = vector.broadcast %cst_43 : f32 to vector<2x128xf32>
      %91 = arith.maximumf %89, %90 : vector<2x128xf32>
      %c0_44 = arith.constant 0 : index
      %c0_45 = arith.constant 0 : index
      %92 = vector.load %arg12[%c0_44, %c0_45] : memref<1x128xf32, #tpu.memory_space<vmem>>, vector<1x128xf32>
      %c0_46 = arith.constant 0 : index
      %c0_47 = arith.constant 0 : index
      %93 = vector.load %arg13[%c0_46, %c0_47] : memref<1x128xf32, #tpu.memory_space<vmem>>, vector<1x128xf32>
      %cst_48 = arith.constant dense<0.000000e+00> : vector<128xf32>
      %94 = vector.multi_reduction <add>, %91, %cst_48 [0] : vector<2x128xf32> to vector<128xf32>
      %95 = vector.shape_cast %94 : vector<128xf32> to vector<1x128xf32>
      %cst_49 = arith.constant 2.000000e+00 : f32
      %96 = vector.broadcast %cst_49 : f32 to vector<1x128xf32>
      %97 = arith.divf %95, %96 : vector<1x128xf32>
      %98 = vector.broadcast %97 : vector<1x128xf32> to vector<2x128xf32>
      %99 = arith.subf %91, %98 : vector<2x128xf32>
      %100 = arith.mulf %99, %99 : vector<2x128xf32>
      %cst_50 = arith.constant dense<0.000000e+00> : vector<128xf32>
      %101 = vector.multi_reduction <add>, %100, %cst_50 [0] : vector<2x128xf32> to vector<128xf32>
      %102 = vector.shape_cast %101 : vector<128xf32> to vector<1x128xf32>
      %cst_51 = arith.constant 2.000000e+00 : f32
      %103 = vector.broadcast %cst_51 : f32 to vector<1x128xf32>
      %104 = arith.divf %102, %103 : vector<1x128xf32>
      %cst_52 = arith.constant 9.99999974E-6 : f32
      %105 = vector.broadcast %cst_52 : f32 to vector<1x128xf32>
      %106 = arith.addf %104, %105 : vector<1x128xf32>
      %107 = math.rsqrt %106 : vector<1x128xf32>
      %108 = vector.broadcast %107 : vector<1x128xf32> to vector<2x128xf32>
      %109 = arith.mulf %99, %108 : vector<2x128xf32>
      %110 = vector.broadcast %92 : vector<1x128xf32> to vector<2x128xf32>
      %111 = arith.mulf %109, %110 : vector<2x128xf32>
      %112 = vector.broadcast %93 : vector<1x128xf32> to vector<2x128xf32>
      %113 = arith.addf %111, %112 : vector<2x128xf32>
      %c0_53 = arith.constant 0 : index
      %c0_54 = arith.constant 0 : index
      %114 = vector.load %arg14[%c0_53, %c0_54] : memref<128x128xf32, #tpu.memory_space<vmem>>, vector<128x128xf32>
      %115 = arith.truncf %113 : vector<2x128xf32> to vector<2x128xbf16>
      %116 = arith.truncf %114 : vector<128x128xf32> to vector<128x128xbf16>
      %cst_55 = arith.constant dense<0.000000e+00> : vector<2x128xf32>
      %117 = tpu.matmul %115, %116, %cst_55 {dimension_numbers = #tpu.dot_dimension_numbers<[1], [0], [0], [1], [0, 0, 1, 1], [], []>} : vector<2x128xbf16>, vector<128x128xbf16>, vector<2x128xf32> -> vector<2x128xf32>
      %c0_56 = arith.constant 0 : index
      %c0_57 = arith.constant 0 : index
      %118 = vector.load %arg15[%c0_56, %c0_57] : memref<1x128xf32, #tpu.memory_space<vmem>>, vector<1x128xf32>
      %119 = vector.broadcast %118 : vector<1x128xf32> to vector<2x128xf32>
      %120 = arith.addf %117, %119 : vector<2x128xf32>
      %121 = tpu.iota {dimensions = array<i32: 1>} : vector<2x128xi32>
      %c4_i32 = arith.constant 4 : i32
      %122 = vector.broadcast %c4_i32 : i32 to vector<2x128xi32>
      %123 = arith.cmpi slt, %121, %122 : vector<2x128xi32>
      %cst_58 = arith.constant -1.000000e+30 : f32
      %124 = vector.broadcast %cst_58 : f32 to vector<2x128xf32>
      %125 = arith.select %123, %120, %124 : vector<2x128xi1>, vector<2x128xf32>
      %cst_59 = arith.constant dense<0xFF800000> : vector<2xf32>
      %126 = vector.multi_reduction <maximumf>, %125, %cst_59 [1] : vector<2x128xf32> to vector<2xf32>
      %127 = vector.shape_cast %126 : vector<2xf32> to vector<2x1xf32>
      %128 = vector.broadcast %127 : vector<2x1xf32> to vector<2x128xf32>
      %129 = arith.subf %125, %128 : vector<2x128xf32>
      %130 = math.exp %129 : vector<2x128xf32>
      %cst_60 = arith.constant dense<0.000000e+00> : vector<2xf32>
      %131 = vector.multi_reduction <add>, %130, %cst_60 [1] : vector<2x128xf32> to vector<2xf32>
      %132 = vector.shape_cast %131 : vector<2xf32> to vector<2x1xf32>
      %133 = math.log %132 : vector<2x1xf32>
      %134 = vector.broadcast %133 : vector<2x1xf32> to vector<2x128xf32>
      %135 = arith.subf %129, %134 : vector<2x128xf32>
      %c0_61 = arith.constant 0 : index
      %c0_62 = arith.constant 0 : index
      %136 = vector.load %arg16[%c0_61, %c0_62] : memref<2x128xf32, #tpu.memory_space<vmem>>, vector<2x128xf32>
      tpu.vector_store %arg16[%c0_61, %c0_62], %135 {strides = array<i32>} : memref<2x128xf32, #tpu.memory_space<vmem>>, vector<2x128xf32>,
    } else {
    }
    return
  }
  func.func @transform_0(%arg0: i32) -> (i32, i32) {
    %c0_i32 = arith.constant 0 : i32
    %c0_i32_0 = arith.constant 0 : i32
    %c0_i32_1 = arith.constant 0 : i32
    return %c0_i32, %c0_i32_0 : i32, i32
  }
  func.func @transform_1(%arg0: i32) -> (i32, i32) {
    %c0_i32 = arith.constant 0 : i32
    %c0_i32_0 = arith.constant 0 : i32
    %c0_i32_1 = arith.constant 0 : i32
    return %c0_i32, %c0_i32_0 : i32, i32
  }
  func.func @transform_2(%arg0: i32) -> (i32, i32, i32) {
    %c0_i32 = arith.constant 0 : i32
    %c0_i32_0 = arith.constant 0 : i32
    %c0_i32_1 = arith.constant 0 : i32
    return %arg0, %c0_i32, %c0_i32_0 : i32, i32, i32
  }
  func.func @transform_3(%arg0: i32) -> (i32, i32, i32) {
    %c0_i32 = arith.constant 0 : i32
    %c0_i32_0 = arith.constant 0 : i32
    %c0_i32_1 = arith.constant 0 : i32
    return %arg0, %c0_i32, %c0_i32_0 : i32, i32, i32
  }
  func.func @transform_4(%arg0: i32) -> (i32, i32, i32) {
    %c0_i32 = arith.constant 0 : i32
    %c0_i32_0 = arith.constant 0 : i32
    %c0_i32_1 = arith.constant 0 : i32
    return %arg0, %c0_i32, %c0_i32_0 : i32, i32, i32
  }
  func.func @transform_5(%arg0: i32) -> (i32, i32, i32) {
    %c0_i32 = arith.constant 0 : i32
    %c0_i32_0 = arith.constant 0 : i32
    %c0_i32_1 = arith.constant 0 : i32
    return %arg0, %c0_i32, %c0_i32_0 : i32, i32, i32
  }
  func.func @transform_6(%arg0: i32) -> (i32, i32) {
    %c0_i32 = arith.constant 0 : i32
    %c0_i32_0 = arith.constant 0 : i32
    %c0_i32_1 = arith.constant 0 : i32
    return %c0_i32, %c0_i32_0 : i32, i32
  }
  func.func @transform_7(%arg0: i32) -> (i32, i32) {
    %c0_i32 = arith.constant 0 : i32
    %c0_i32_0 = arith.constant 0 : i32
    %c0_i32_1 = arith.constant 0 : i32
    return %c0_i32, %c0_i32_0 : i32, i32
  }
  func.func @transform_8(%arg0: i32) -> (i32, i32) {
    %c0_i32 = arith.constant 0 : i32
    %c0_i32_0 = arith.constant 0 : i32
    %c0_i32_1 = arith.constant 0 : i32
    return %c0_i32, %c0_i32_0 : i32, i32
  }
  func.func @transform_9(%arg0: i32) -> (i32, i32) {
    %c0_i32 = arith.constant 0 : i32
    %c0_i32_0 = arith.constant 0 : i32
    %c0_i32_1 = arith.constant 0 : i32
    return %c0_i32, %c0_i32_0 : i32, i32
  }
  func.func @transform_10(%arg0: i32) -> (i32, i32) {
    %c0_i32 = arith.constant 0 : i32
    %c0_i32_0 = arith.constant 0 : i32
    %c0_i32_1 = arith.constant 0 : i32
    return %c0_i32, %c0_i32_0 : i32, i32
  }
  func.func @transform_11(%arg0: i32) -> (i32, i32) {
    %c0_i32 = arith.constant 0 : i32
    %c0_i32_0 = arith.constant 0 : i32
    %c0_i32_1 = arith.constant 0 : i32
    return %c0_i32, %c0_i32_0 : i32, i32
  }
  func.func @transform_12(%arg0: i32) -> (i32, i32) {
    %c0_i32 = arith.constant 0 : i32
    %c0_i32_0 = arith.constant 0 : i32
    %c0_i32_1 = arith.constant 0 : i32
    return %c0_i32, %c0_i32_0 : i32, i32
  }
  func.func @transform_13(%arg0: i32) -> (i32, i32) {
    %c0_i32 = arith.constant 0 : i32
    %c0_i32_0 = arith.constant 0 : i32
    %c0_i32_1 = arith.constant 0 : i32
    return %c0_i32, %c0_i32_0 : i32, i32
  }
  func.func @transform_14(%arg0: i32) -> (i32, i32) {
    %c0_i32 = arith.constant 0 : i32
    %c0_i32_0 = arith.constant 0 : i32
    %c0_i32_1 = arith.constant 0 : i32
    return %c0_i32, %c0_i32_0 : i32, i32
  }
  func.func @transform_15(%arg0: i32) -> (i32, i32) {
    %c0_i32 = arith.constant 0 : i32
    %c0_i32_0 = arith.constant 0 : i32
    %c0_i32_1 = arith.constant 0 : i32
    return %c0_i32, %c0_i32_0 : i32, i32
  }
}

</mosaic_0001>

<bundles_post_ra>
// kernel: resgcn_forward.1
= control target key start
LH: loop header
LB: loop body
LE: loop exit
PB: predicated region body
PF: predicated region fallthrough
CT: control target
= control target key end

     0   :  { %s2641_s0 = inlined_call_operand.vmem [shape: f32[16,128], index: 0, kind: input, shape index: {}]   ;;  %s2642_s1 = inlined_call_operand.vmem [shape: bf16[16,16], index: 1, kind: input, shape index: {}]   ;;  %s2643_s2 = inlined_call_operand.hbm [shape: f32[4,128,128], index: 2, kind: input, shape index: {}]   ;;  %s2644_s3 = inlined_call_operand.vmem [shape: f32[4,1,128], index: 3, kind: input, shape index: {}]   ;;  %s2645_s4 = inlined_call_operand.hbm [shape: f32[4,1,128], index: 4, kind: input, shape index: {}]   ;;  %s2646_s5 = inlined_call_operand.hbm [shape: f32[4,1,128], index: 5, kind: input, shape index: {}]   ;;  %s2647_s6 = inlined_call_operand.vmem [shape: f32[2,16], index: 6, kind: input, shape index: {}]   ;;  %s2648_s7 = inlined_call_operand.hbm [shape: f32[1,128], index: 7, kind: input, shape index: {}]   ;;  %s2649_s8 = inlined_call_operand.hbm [shape: f32[1,128], index: 8, kind: input, shape index: {}]   ;;  %s2650_s9 = inlined_call_operand.hbm [shape: f32[128,128], index: 9, kind: input, shape index: {}]   ;;  %s2651_s10 = inlined_call_operand.hbm [shape: f32[1,128], index: 10, kind: input, shape index: {}]   ;;  %s2652_s11 = inlined_call_operand.hbm [shape: f32[1,128], index: 11, kind: input, shape index: {}]   ;;  %s2653_s12 = inlined_call_operand.hbm [shape: f32[1,128], index: 12, kind: input, shape index: {}]   ;;  %s2654_s13 = inlined_call_operand.hbm [shape: f32[128,128], index: 13, kind: input, shape index: {}]   ;;  %s2655_s14 = inlined_call_operand.hbm [shape: f32[1,128], index: 14, kind: input, shape index: {}]   ;;  %s2656_s15 = inlined_call_operand.hbm [shape: f32[2,128], index: 15, kind: output, shape index: {}]  }
   0x1   :  { %2679 = sst [smem:[#allocation33_spill]] %s2641_s0 }
   0x2   :  { %2680 = sst [smem:[#allocation34_spill]] %s2642_s1 }
   0x3   :  { %2681 = sst [smem:[#allocation35_spill]] %s2644_s3 }
   0x4   :  { %2682 = sst [smem:[#allocation36_spill]] %s2645_s4 }
   0x5   :  { %2683 = sst [smem:[#allocation37_spill]] %s2647_s6 }
   0x6   :  { %2684 = sst [smem:[#allocation38_spill]] %s2648_s7 }
   0x7   :  { %2685 = sst [smem:[#allocation39_spill]] %s2650_s9 }
   0x8   :  { %2686 = sst [smem:[#allocation40_spill]] %s2652_s11 }
   0x9   :  { %2687 = sst [smem:[#allocation41_spill]] %s2654_s13 }
   0xa   :  { %2688 = sst [smem:[#allocation42_spill]] %s2656_s15 }
   0xb   :  { %20 = vsyncpa [#allocation4], 0 }
   0xc   :  { %22 = vsyncpa [#allocation4 + $0x1], 0 }
   0xd   :  { %23 = vsyncpa [#allocation7], 0 }
   0xe   :  { %25 = vsyncpa [#allocation7 + $0x1], 0 }
   0xf   :  { %26 = vsyncpa [#allocation10], 0 }
  0x10   :  { %27 = vsyncpa [#allocation13], 0 }
  0x11   :  { %28 = vsyncpa [#allocation16], 0 }
  0x12   :  { %29 = vsyncpa [#allocation19], 0 }
  0x13   :  { %30 = vsyncpa [#allocation5], 0  ;;  %s2152_s18 = smov 0   ;;  %s2154_s19 = smov 0  }
  0x14   :  { %s2156_s20 = smov 0   ;;  %s2158_s21 = smov 0  }
  0x15 LB: > { %2689 = sst [smem:[#allocation29_spill]] %s2047_s20  ;;  %s2053_s22 = smov [#allocation9]   ;;  %s2051_s21 = sphi %s2158_s21, %s2733_s21   ;;  %s2047_s20 = sphi %s2156_s20, %s2735_s20   ;;  %s2043_s19 = sphi %s2154_s19, %s2737_s19   ;;  %s2039_s18 = sphi %s2152_s18, %s2736_s18  }
  0x16   : > { %s419_s23 = sshll.u32 %s2053_s22, 4  ;;  %s2173_s24 = sadd.s32 4294967295, %s2051_s21   ;;  %s420_s23 = int_to_ptr.vmem [resolvable:$true] %s419_s23 }
  0x17   : > { %2690 = sst [smem:[#allocation30_spill]] %s2173_s24  ;;  %p1351_p0 = scmp.ge.s32.totalorder %s2051_s21, 1 }
  0x18   : > { %p2658_p1 = scmp.eq.s32.totalorder %s2173_s24, 0  ;;  %p397_p2 = scmp.lt.s32.totalorder %s2051_s21, 5 }
  0x19   : > { %s2054_s26 = smov [#allocation12]   ;;  %s2055_s29 = smov [#allocation15]  }
  0x1a   : > { %p2179_p4 = pnand %p1351_p0, %p397_p2  ;;  %s440_s27 = sshll.u32 %s2054_s26, 4  ;;  %s2185_s27 = int_to_ptr.vmem [resolvable:$true] %s440_s27 }
  0x1b   : > { %s465_s30 = sshll.u32 %s2055_s29, 4  ;;  %s2693_s7 = sld [smem:[#allocation38_spill]]  ;;  %s2193_s30 = int_to_ptr.vmem [resolvable:$true] %s465_s30 }
  0x1c   : > { %s2691_s25 = scalar_select %p2179_p4, 1, 0 }
  0x1d   : > { %p1540_p5 = pneg %p2179_p4 }
  0x1f   : > { %p2189_p6 = pnand %p1540_p5, %p2658_p1 }
  0x21   : > { %s2692_s28 = scalar_select %p2189_p6, 1, 0 }
  0x22   : > { %s1653_s22 = scalar_lea.hbm %s2693_s7, 16  ;;  %p2203_p8 = pneg %p2189_p6 }
  0x23   : > { %p1654_p7 = scmp.ne.s32.totalorder %s2693_s7, %s1653_s22  ;;  %p1660_p11 = scmp.lt.u32.totalorder %s1653_s22, %s2693_s7 }
  0x24   : > { %s2694_s26 = scalar_select %p2203_p8, 1, 0 }
  0x25   : > { %p1656_p9 = pnand %p2203_p8, %p1654_p7 }
  0x27   : > { %p1657_p10 = pneg %p1656_p9 }
  0x29   : > { %p1662_p12 = pnand %p1660_p11, %p1657_p10 }
  0x2b   : > { %1665 = shalt.err (!%p1662_p12)
}
  0x2c   : > { %s1666_s16 = scalar_lea.vmem %s420_s23, 16  ;;  %s1673_s6 = scalar_lea.vmem %s420_s23, 32 }
  0x2d   : > { %p1667_p13 = scmp.ne.s32.totalorder %s420_s23, %s1666_s16  ;;  %p1674_p5 = scmp.lt.s32.totalorder %s420_s23, %s420_s23 }
  0x2e   : > { %p1675_p3 = scmp.lt.s32.totalorder %s1673_s6, %s1666_s16 }
  0x2f   : > { %p1669_p0 = pnand %p1667_p13, %p2203_p8 }
  0x30   : > { %p1676_p1 = por %p1675_p3, %p1674_p5 }
  0x31   : > { %p1670_p2 = pneg %p1669_p0 }
  0x33   : > { %p1677_p4 = pnand %p1676_p1, %p1670_p2 }
  0x35   : > { %1680 = shalt.err (!%p1677_p4)
}
  0x36   : > { %1543 = dma.hbm_to_vmem [thread:$0]  (!%p2189_p6), %s2693_s7, 16, %s420_s23, [#allocation10]  }
  0x37   : > { %s2695_s9 = sld [smem:[#allocation39_spill]] }
  0x3d   : > { %s1681_s29 = scalar_lea.hbm %s2695_s9, 2048 }
  0x3e   : > { %p1682_p7 = scmp.ne.s32.totalorder %s2695_s9, %s1681_s29  ;;  %p1688_p1 = scmp.lt.u32.totalorder %s1681_s29, %s2695_s9 }
  0x40   : > { %p1684_p9 = pnand %p1682_p7, %p2203_p8 }
  0x42   : > { %p1685_p3 = pneg %p1684_p9 }
  0x44   : > { %p1690_p4 = pnand %p1688_p1, %p1685_p3 }
  0x46   : > { %1693 = shalt.err (!%p1690_p4)
}
  0x47   : > { %s1694_s23 = scalar_lea.vmem %s2185_s27, 2048  ;;  %p1702_p13 = scmp.lt.s32.totalorder %s2185_s27, %s2185_s27 }
  0x48   : > { %p1695_p10 = scmp.ne.s32.totalorder %s2185_s27, %s1694_s23  ;;  %p1703_p0 = scmp.lt.s32.totalorder %s1694_s23, %s1694_s23 }
  0x4a   : > { %p1697_p11 = pnand %p1695_p10, %p2203_p8  ;;  %p1704_p2 = por %p1703_p0, %p1702_p13 }
  0x4c   : > { %p1698_p12 = pneg %p1697_p11 }
  0x4e   : > { %p1705_p5 = pnand %p1704_p2, %p1698_p12 }
  0x50   : > { %1708 = shalt.err (!%p1705_p5)
}
  0x51   : > { %s2661_s0 = smov 128   ;;  %s2663_s3 = smov 8  }
  0x52   : > { %1549 = dma.hbm_to_vmem [thread:$0]  (!%p2189_p6), %s2695_s9, 2048, %s2185_s27, [#allocation13], %s2661_s0, %s2661_s0, %s2663_s3  }
  0x53   : > { %s2696_s11 = sld [smem:[#allocation40_spill]] }
  0x59   : > { %s1709_s29 = scalar_lea.hbm %s2696_s11, 16 }
  0x5a   : > { %p1710_p7 = scmp.ne.s32.totalorder %s2696_s11, %s1709_s29  ;;  %p1716_p1 = scmp.lt.u32.totalorder %s1709_s29, %s2696_s11 }
  0x5c   : > { %p1712_p9 = pnand %p1710_p7, %p2203_p8 }
  0x5e   : > { %p1713_p3 = pneg %p1712_p9 }
  0x60   : > { %p1718_p4 = pnand %p1716_p1, %p1713_p3 }
  0x62   : > { %1721 = shalt.err (!%p1718_p4)
}
  0x63   : > { %s1722_s27 = scalar_lea.vmem %s2193_s30, 16  ;;  %s1729_s15 = scalar_lea.vmem %s2193_s30, 32 }
  0x64   : > { %p1723_p10 = scmp.ne.s32.totalorder %s2193_s30, %s1722_s27  ;;  %p1730_p13 = scmp.lt.s32.totalorder %s2193_s30, %s2193_s30 }
  0x65   : > { %p1731_p0 = scmp.lt.s32.totalorder %s1729_s15, %s1722_s27 }
  0x66   : > { %p1725_p11 = pnand %p1723_p10, %p2203_p8 }
  0x67   : > { %p1732_p2 = por %p1731_p0, %p1730_p13 }
  0x68   : > { %p1726_p12 = pneg %p1725_p11 }
  0x6a   : > { %p1733_p5 = pnand %p1732_p2, %p1726_p12 }
  0x6c   : > { %1736 = shalt.err (!%p1733_p5)
}
  0x6d   : > { %1555 = dma.hbm_to_vmem [thread:$0]  (!%p2189_p6), %s2696_s11, 16, %s2193_s30, [#allocation16]  }
  0x6e   : > { %s2058_s1 = smov [#allocation18]   ;;  %s2697_s13 = sld [smem:[#allocation41_spill]] }
  0x6f   : > { %s486_s22 = sshll.u32 %s2058_s1, 4  ;;  %s487_s22 = int_to_ptr.vmem [resolvable:$true] %s486_s22 }
  0x74   : > { %s1737_s6 = scalar_lea.hbm %s2697_s13, 2048 }
  0x75   : > { %p1738_p7 = scmp.ne.s32.totalorder %s2697_s13, %s1737_s6  ;;  %p1744_p1 = scmp.lt.u32.totalorder %s1737_s6, %s2697_s13 }
  0x77   : > { %p1740_p9 = pnand %p1738_p7, %p2203_p8 }
  0x79   : > { %p1741_p3 = pneg %p1740_p9 }
  0x7b   : > { %p1746_p4 = pnand %p1744_p1, %p1741_p3 }
  0x7d   : > { %1749 = shalt.err (!%p1746_p4)
}
  0x7e   : > { %s1750_s30 = scalar_lea.vmem %s487_s22, 2048  ;;  %p1758_p13 = scmp.lt.s32.totalorder %s487_s22, %s487_s22 }
  0x7f   : > { %p1751_p10 = scmp.ne.s32.totalorder %s487_s22, %s1750_s30  ;;  %p1759_p0 = scmp.lt.s32.totalorder %s1750_s30, %s1750_s30 }
  0x81   : > { %p1753_p11 = pnand %p1751_p10, %p2203_p8  ;;  %p1760_p2 = por %p1759_p0, %p1758_p13 }
  0x83   : > { %p1754_p12 = pneg %p1753_p11 }
  0x85   : > { %p1761_p5 = pnand %p1760_p2, %p1754_p12 }
  0x87   : > { %1764 = shalt.err (!%p1761_p5)
}
  0x88   : > { %s2698_s7 = smov 128   ;;  %s2291_s1 = sadd.s32 1, %s2051_s21  }
  0x89   : > { %1561 = dma.hbm_to_vmem [thread:$0]  (!%p2189_p6), %s2697_s13, 2048, %s487_s22, [#allocation19], %s2698_s7, %s2698_s7, %s2663_s3  }
  0x8a   : > { %2699 = sst [smem:[#allocation31_spill]] %s2291_s1  ;;  %s85_s29 = sadd.s32 1, %s2047_s20 }
  0x8b   : > { %s82_s16 = ssub.s32 %s2051_s21, %s2291_s1  ;;  %p92_p7 = scmp.ne.s32.totalorder %s2047_s20, %s2043_s19 }
  0x8c   : > { %p83_p9 = scmp.eq.s32.totalorder %s82_s16, 0  ;;  %p93_p3 = scmp.eq.s32.totalorder %s2051_s21, 0 }
  0x8d   : > { %p98_p1 = scmp.ne.s32.totalorder %s2043_s19, %s2039_s18  ;;  %p1583_p4 = scmp.lt.s32.totalorder %s2051_s21, 4 }
  0x8e   : > { %s2303_s6 = scalar_select %p83_p9, %s2047_s20, %s85_s29  }
  0x8f   : > { %p94_p10 = por %p93_p3, %p92_p7  ;;  %p2701_p11 = scmp.eq.s32.totalorder %s2173_s24, 0 }
  0x90   : > { %2700 = sst [smem:[#allocation32_spill]] %s2303_s6  ;;  %s2312_s27 = sand.u32 1, %s2047_s20  }
  0x91   : > { %p2307_p12 = por %p2701_p11, %p98_p1  ;;  %s538_s22 = sand.u32 1, %s2051_s21  }
  0x92   : > { %p2315_p13 = pnand %p1583_p4, %p94_p10  ;;  %s1364_s30 = sshll.u32 %s2051_s21, 4 }
  0x93   : > { %s2702_s23 = scalar_select %p2307_p12, 1, 0 }
  0x94   : > { %s2703_s15 = scalar_select %p2315_p13, 1, 0 }
  0x95   : > { %s2704_s4 = sld [smem:[#allocation36_spill]]  ;;  %s541_s29 = scalar_lea.vmem [#allocation6], %s2312_s27 }
  0x96   : > { %s548_s16 = sshll.u32 %s541_s29, 4  ;;  %s2329_s11 = scalar_lea.hbm %s2646_s5, %s1364_s30  ;;  %s2331_s16 = int_to_ptr.vmem [resolvable:$true] %s548_s16 }
  0x97   : > { %s2333_s13 = scalar_lea.sflag [#allocation7], %s538_s22  ;;  %p2339_p2 = pneg %p2315_p13 }
  0x99   : > { %s2705_s18 = scalar_select %p2339_p2, 1, 0 }
  0x9b   : > { %s2323_s17 = scalar_lea.hbm %s2704_s4, %s1364_s30  ;;  %s1770_s9 = scalar_lea.hbm %s2704_s4, 64 }
  0x9c   : > { %s1765_s6 = scalar_lea.hbm %s2323_s17, 16  ;;  %p1771_p9 = scmp.lt.u32.totalorder %s2323_s17, %s2704_s4 }
  0x9d   : > { %p1766_p0 = scmp.ne.s32.totalorder %s2323_s17, %s1765_s6  ;;  %p1772_p3 = scmp.lt.u32.totalorder %s1770_s9, %s1765_s6 }
  0x9e   : > { %p1774_p4 = scmp.lt.u32.totalorder %s1765_s6, %s2323_s17 }
  0x9f   : > { %p1768_p5 = pnand %p2339_p2, %p1766_p0  ;;  %p1773_p1 = por %p1772_p3, %p1771_p9 }
  0xa1   : > { %p1769_p7 = pneg %p1768_p5  ;;  %p1775_p10 = por %p1774_p4, %p1773_p1 }
  0xa3   : > { %p1776_p11 = pnand %p1775_p10, %p1769_p7 }
  0xa5   : > { %1779 = shalt.err (!%p1776_p11)
}
  0xa6   : > { %s1780_s22 = scalar_lea.vmem %s2331_s16, 16  ;;  %s2059_s0 = smov [#allocation6]  }
  0xa7   : > { %p1781_p0 = scmp.ne.s32.totalorder %s2331_s16, %s1780_s22  ;;  %s1785_s29 = sshll.u32 %s2059_s0, 4  ;;  %s1786_s29 = int_to_ptr.vmem [resolvable:$false] %s1785_s29 }
  0xa8   : > { %s1787_s3 = scalar_lea.vmem %s1786_s29, 32  ;;  %p1788_p6 = scmp.lt.s32.totalorder %s2331_s16, %s1786_s29 }
  0xa9   : > { %p1783_p5 = pnand %p1781_p0, %p2339_p2  ;;  %p1789_p8 = scmp.lt.s32.totalorder %s1787_s3, %s1780_s22 }
  0xab   : > { %p1784_p12 = pneg %p1783_p5  ;;  %p1790_p9 = por %p1789_p8, %p1788_p6 }
  0xad   : > { %p1791_p3 = pnand %p1790_p9, %p1784_p12 }
  0xaf   : > { %1794 = shalt.err (!%p1791_p3)
}
  0xb0   : > { %1571 = dma.hbm_to_vmem [thread:$0]  (!%p2315_p13), %s2323_s17, 16, %s2331_s16, %s2333_s13  }
  0xb1   : > { %s2060_s6 = smov [#allocation11]   ;;  %s2061_s30 = smov [#allocation14]  }
  0xb2   : > { %s430_s9 = sshll.u32 %s2060_s6, 4  ;;  %s454_s4 = sshll.u32 %s2061_s30, 4  ;;  %s431_s9 = int_to_ptr.vmem [resolvable:$true] %s430_s9  ;;  %s455_s4 = int_to_ptr.vmem [resolvable:$true] %s454_s4 }
  0xb3   : > { %s1795_s29 = scalar_lea.hbm %s2649_s8, 16  ;;  %p2706_p8 = scmp.ne.s32.totalorder %s2694_s26, 0 }
  0xb4   : > { %p1796_p6 = scmp.ne.s32.totalorder %s2649_s8, %s1795_s29  ;;  %p1802_p1 = scmp.lt.u32.totalorder %s1795_s29, %s2649_s8 }
  0xb6   : > { %p1798_p12 = pnand %p1796_p6, %p2706_p8 }
  0xb8   : > { %p1799_p7 = pneg %p1798_p12 }
  0xba   : > { %p1804_p4 = pnand %p1802_p1, %p1799_p7 }
  0xbc   : > { %1807 = shalt.err (!%p1804_p4)
}
  0xbd   : > { %s1808_s17 = scalar_lea.vmem %s431_s9, 16  ;;  %s1815_s20 = scalar_lea.vmem %s431_s9, 32 }
  0xbe   : > { %p1809_p10 = scmp.ne.s32.totalorder %s431_s9, %s1808_s17  ;;  %p1816_p5 = scmp.lt.s32.totalorder %s431_s9, %s431_s9 }
  0xbf   : > { %p1817_p9 = scmp.lt.s32.totalorder %s1815_s20, %s1808_s17 }
  0xc0   : > { %p1811_p11 = pnand %p1809_p10, %p2706_p8 }
  0xc1   : > { %p1818_p3 = por %p1817_p9, %p1816_p5 }
  0xc2   : > { %p1812_p0 = pneg %p1811_p11 }
  0xc4   : > { %p1819_p13 = pnand %p1818_p3, %p1812_p0 }
  0xc6   : > { %1822 = shalt.err (!%p1819_p13)
}
  0xc7   : > { %p2707_p6 = scmp.ne.s32.totalorder %s2692_s28, 0  ;;  %s1823_s30 = scalar_lea.hbm %s2651_s10, 16 }
  0xc8   : > { %p1824_p12 = scmp.ne.s32.totalorder %s2651_s10, %s1823_s30  ;;  %p1830_p13 = scmp.lt.u32.totalorder %s1823_s30, %s2651_s10 }
  0xc9   : > { %1546 = dma.hbm_to_vmem [thread:$0]  (!%p2707_p6), %s2649_s8, 16, %s431_s9, [#allocation10]  }
  0xca   : > { %p1826_p7 = pnand %p1824_p12, %p2706_p8 }
  0xcc   : > { %p1827_p1 = pneg %p1826_p7 }
  0xce   : > { %p1832_p4 = pnand %p1830_p13, %p1827_p1 }
  0xd0   : > { %1835 = shalt.err (!%p1832_p4)
}
  0xd1   : > { %s1836_s17 = scalar_lea.vmem %s455_s4, 16  ;;  %s1843_s9 = scalar_lea.vmem %s455_s4, 32 }
  0xd2   : > { %p1837_p10 = scmp.ne.s32.totalorder %s455_s4, %s1836_s17  ;;  %p1844_p5 = scmp.lt.s32.totalorder %s455_s4, %s455_s4 }
  0xd3   : > { %p1845_p9 = scmp.lt.s32.totalorder %s1843_s9, %s1836_s17 }
  0xd4   : > { %p1839_p11 = pnand %p1837_p10, %p2706_p8 }
  0xd5   : > { %p1846_p3 = por %p1845_p9, %p1844_p5 }
  0xd6   : > { %p1840_p0 = pneg %p1839_p11 }
  0xd8   : > { %p1847_p2 = pnand %p1846_p3, %p1840_p0 }
  0xda   : > { %1850 = shalt.err (!%p1847_p2)
}
  0xdb   : > { %1552 = dma.hbm_to_vmem [thread:$0]  (!%p2707_p6), %s2651_s10, 16, %s455_s4, [#allocation13]  }
  0xdc   : > { %s2062_s6 = smov [#allocation17]   ;;  %s2063_s1 = smov [#allocation20]  }
  0xdd   : > { %s476_s24 = sshll.u32 %s2062_s6, 4  ;;  %s500_s30 = sshll.u32 %s2063_s1, 4  ;;  %s477_s24 = int_to_ptr.vmem [resolvable:$true] %s476_s24  ;;  %s501_s30 = int_to_ptr.vmem [resolvable:$true] %s500_s30 }
  0xde   : > { %s1851_s22 = scalar_lea.hbm %s2653_s12, 16 }
  0xdf   : > { %p1852_p2 = scmp.ne.s32.totalorder %s2653_s12, %s1851_s22  ;;  %p1858_p1 = scmp.lt.u32.totalorder %s1851_s22, %s2653_s12 }
  0xe1   : > { %p1854_p12 = pnand %p1852_p2, %p2706_p8 }
  0xe3   : > { %p1855_p7 = pneg %p1854_p12 }
  0xe5   : > { %p1860_p13 = pnand %p1858_p1, %p1855_p7 }
  0xe7   : > { %1863 = shalt.err (!%p1860_p13)
}
  0xe8   : > { %s1864_s4 = scalar_lea.vmem %s477_s24, 16  ;;  %s1871_s16 = scalar_lea.vmem %s477_s24, 32 }
  0xe9   : > { %p1865_p4 = scmp.ne.s32.totalorder %s477_s24, %s1864_s4  ;;  %p1872_p0 = scmp.lt.s32.totalorder %s477_s24, %s477_s24 }
  0xea   : > { %p1873_p5 = scmp.lt.s32.totalorder %s1871_s16, %s1864_s4 }
  0xeb   : > { %p1867_p10 = pnand %p1865_p4, %p2706_p8 }
  0xec   : > { %p1874_p9 = por %p1873_p5, %p1872_p0 }
  0xed   : > { %p1868_p11 = pneg %p1867_p10 }
  0xef   : > { %p1875_p3 = pnand %p1874_p9, %p1868_p11 }
  0xf1   : > { %1878 = shalt.err (!%p1875_p3)
}
  0xf2   : > { %1558 = dma.hbm_to_vmem [thread:$0]  (!%p2707_p6), %s2653_s12, 16, %s477_s24, [#allocation16]  }
  0xf3   : > { %s1879_s22 = scalar_lea.hbm %s2655_s14, 16 }
  0xf4   : > { %p1880_p2 = scmp.ne.s32.totalorder %s2655_s14, %s1879_s22  ;;  %p1886_p1 = scmp.lt.u32.totalorder %s1879_s22, %s2655_s14 }
  0xf6   : > { %p1882_p12 = pnand %p1880_p2, %p2706_p8 }
  0xf8   : > { %p1883_p7 = pneg %p1882_p12 }
  0xfa   : > { %p1888_p13 = pnand %p1886_p1, %p1883_p7 }
  0xfc   : > { %1891 = shalt.err (!%p1888_p13)
}
  0xfd   : > { %s1892_s4 = scalar_lea.vmem %s501_s30, 16  ;;  %s1899_s24 = scalar_lea.vmem %s501_s30, 32 }
  0xfe   : > { %p1893_p4 = scmp.ne.s32.totalorder %s501_s30, %s1892_s4  ;;  %p1900_p0 = scmp.lt.s32.totalorder %s501_s30, %s501_s30 }
  0xff   : > { %p1901_p5 = scmp.lt.s32.totalorder %s1899_s24, %s1892_s4 }
 0x100   : > { %p1895_p10 = pnand %p1893_p4, %p2706_p8 }
 0x101   : > { %p1902_p9 = por %p1901_p5, %p1900_p0 }
 0x102   : > { %p1896_p11 = pneg %p1895_p10 }
 0x104   : > { %p1903_p3 = pnand %p1902_p9, %p1896_p11 }
 0x106   : > { %1906 = shalt.err (!%p1903_p3)
}
 0x107   : > { %1564 = dma.hbm_to_vmem [thread:$0]  (!%p2707_p6), %s2655_s14, 16, %s501_s30, [#allocation19]  }
 0x108   : > { %s1361_s26 = sshll.u32 %s2312_s27, 7  ;;  %s1394_s1 = sshll.u32 %s2051_s21, 11 }
 0x109   : > { %s2440_s22 = scalar_lea.hbm %s2643_s2, %s1394_s1  ;;  %s515_s28 = scalar_lea.vmem [#allocation3], %s1361_s26 }
 0x10a   : > { %s522_s3 = sshll.u32 %s515_s28, 4  ;;  %s558_s17 = scalar_lea.vmem [#allocation8], %s2312_s27  ;;  %s2442_s3 = int_to_ptr.vmem [resolvable:$true] %s522_s3 }
 0x10b   : > { %s2445_s9 = sshll.u32 %s558_s17, 4  ;;  %s512_s20 = scalar_lea.sflag [#allocation4], %s2312_s27  ;;  %s566_s9 = int_to_ptr.vmem [resolvable:$true] %s2445_s9 }
 0x10c   : > { %s1907_s30 = scalar_lea.hbm %s2440_s22, 2048  ;;  %p2708_p6 = scmp.ne.s32.totalorder %s2705_s18, 0 }
 0x10d   : > { %p1908_p8 = scmp.ne.s32.totalorder %s2440_s22, %s1907_s30  ;;  %s1912_s24 = scalar_lea.hbm %s2643_s2, 8192 }
 0x10e   : > { %p1913_p7 = scmp.lt.u32.totalorder %s2440_s22, %s2643_s2  ;;  %p1914_p1 = scmp.lt.u32.totalorder %s1912_s24, %s1907_s30 }
 0x10f   : > { %p1910_p2 = pnand %p1908_p8, %p2708_p6  ;;  %p1916_p4 = scmp.lt.u32.totalorder %s1907_s30, %s2440_s22 }
 0x110   : > { %p1915_p13 = por %p1914_p1, %p1913_p7 }
 0x111   : > { %p1911_p12 = pneg %p1910_p2 }
 0x112   : > { %p1917_p10 = por %p1916_p4, %p1915_p13 }
 0x114   : > { %p1918_p11 = pnand %p1917_p10, %p1911_p12 }
 0x116   : > { %1921 = shalt.err (!%p1918_p11)
}
 0x117   : > { %s1922_s26 = scalar_lea.vmem %s2442_s3, 2048  ;;  %s2064_s1 = smov [#allocation3]  }
 0x118   : > { %p1923_p0 = scmp.ne.s32.totalorder %s2442_s3, %s1922_s26  ;;  %s1927_s0 = sshll.u32 %s2064_s1, 4  ;;  %s1928_s0 = int_to_ptr.vmem [resolvable:$false] %s1927_s0 }
 0x119   : > { %s1929_s29 = scalar_lea.vmem %s1928_s0, 4096  ;;  %p1930_p3 = scmp.lt.s32.totalorder %s2442_s3, %s1928_s0 }
 0x11a   : > { %p1925_p5 = pnand %p1923_p0, %p2708_p6  ;;  %p1931_p8 = scmp.lt.s32.totalorder %s1929_s29, %s1922_s26 }
 0x11c   : > { %p1926_p9 = pneg %p1925_p5  ;;  %p1932_p2 = por %p1931_p8, %p1930_p3 }
 0x11e   : > { %p1933_p7 = pnand %p1932_p2, %p1926_p9 }
 0x120   : > { %1936 = shalt.err (!%p1933_p7)
}
 0x121   : > { %p2709_p12 = scmp.ne.s32.totalorder %s2703_s15, 0  ;;  %s2710_s28 = smov 8  }
 0x122   : > { %s1937_s17 = scalar_lea.hbm %s2329_s11, 16  ;;  %s1942_s4 = scalar_lea.hbm %s2646_s5, 64 }
 0x123   : > { %1568 = dma.hbm_to_vmem [thread:$0]  (!%p2709_p12), %s2440_s22, 2048, %s2442_s3, %s512_s20, %s2698_s7, %s2698_s7, %s2710_s28  }
 0x124   : > { %p1938_p1 = scmp.ne.s32.totalorder %s2329_s11, %s1937_s17  ;;  %p1943_p10 = scmp.lt.u32.totalorder %s2329_s11, %s2646_s5 }
 0x125   : > { %p1944_p11 = scmp.lt.u32.totalorder %s1942_s4, %s1937_s17  ;;  %p1946_p5 = scmp.lt.u32.totalorder %s1937_s17, %s2329_s11 }
 0x126   : > { %p1940_p13 = pnand %p1938_p1, %p2708_p6 }
 0x127   : > { %p1945_p0 = por %p1944_p11, %p1943_p10 }
 0x128   : > { %p1941_p4 = pneg %p1940_p13 }
 0x129   : > { %p1947_p9 = por %p1946_p5, %p1945_p0 }
 0x12b   : > { %p1948_p3 = pnand %p1947_p9, %p1941_p4 }
 0x12d   : > { %1951 = shalt.err (!%p1948_p3)
}
 0x12e   : > { %s1952_s7 = scalar_lea.vmem %s566_s9, 16  ;;  %s2065_s22 = smov [#allocation8]  }
 0x12f   : > { %p1953_p8 = scmp.ne.s32.totalorder %s566_s9, %s1952_s7  ;;  %s1957_s3 = sshll.u32 %s2065_s22, 4  ;;  %s1958_s3 = int_to_ptr.vmem [resolvable:$false] %s1957_s3 }
 0x130   : > { %s1959_s20 = scalar_lea.vmem %s1958_s3, 32  ;;  %p1960_p1 = scmp.lt.s32.totalorder %s566_s9, %s1958_s3 }
 0x131   : > { %p1955_p2 = pnand %p1953_p8, %p2708_p6  ;;  %p1961_p13 = scmp.lt.s32.totalorder %s1959_s20, %s1952_s7 }
 0x133   : > { %p1956_p7 = pneg %p1955_p2  ;;  %p1962_p12 = por %p1961_p13, %p1960_p1 }
 0x135   : > { %p1963_p10 = pnand %p1962_p12, %p1956_p7 }
 0x137   : > { %1966 = shalt.err (!%p1963_p10)
}
 0x138   : > { %p2711_p11 = scmp.ne.s32.totalorder %s2703_s15, 0  ;;  %p2712_p4 = scmp.ne.s32.totalorder %s2691_s25, 0 }
 0x139   : > { %s2496_s18 = sand.u32 (!%p2712_p4), 1, %s2043_s19   ;;  %p2713_p6 = scmp.ne.s32.totalorder (!%p2712_p4), %s2702_s23, 0 }
 0x13a   : > { %1574 = dma.hbm_to_vmem [thread:$0]  (!%p2711_p11), %s2329_s11, 16, %s566_s9, %s2333_s13  }
 0x13b   : > { %574 = sbr.rel (%p2712_p4) target bundleno = 1968 (0x7b0), region = 80  ;;  %s1367_s16 = sshll.u32 (!%p2712_p4), %s2496_s18, 7 }
 0x13c   : > { %s577_s6 = scalar_lea.sflag (!%p2712_p4), [#allocation4], %s2496_s18  ;;  %s2500_s26 = scalar_lea.vmem (!%p2712_p4), [#allocation3], %s1367_s16 }
 0x142   : > { %2010 = dma.done.wait (%p2713_p6), %s577_s6, 2048  }
 0x143   : > { %2012 = vsyncadd (%p2713_p6), %s577_s6, 4294965248  ;;  %s2714_s15 = sld [smem:[#allocation30_spill]]  ;;  %s588_s25 = scalar_lea.vmem [#allocation6], %s2496_s18 }
 0x149   : > { %s585_s11 = sand.u32 1, %s2714_s15  }
 0x14a   : > { %s586_s13 = scalar_lea.sflag [#allocation7], %s585_s11 }
 0x14b   : > { %2014 = dma.done.wait (%p2713_p6), %s586_s13, 32  }
 0x14c   : > { %2016 = vsyncadd (%p2713_p6), %s586_s13, 4294967264  ;;  %s596_s9 = scalar_lea.vmem [#allocation8], %s2496_s18  ;;  %p2715_p12 = scmp.eq.s32.totalorder %s2714_s15, 0 }
 0x14e   : > { %2018 = dma.done.wait (%p2715_p12), [#allocation10], 32   ;;  %p2716_p0 = pmov %p2715_p12 }
 0x150   : > { %2020 = vsyncadd (%p2716_p0), [#allocation10], 4294967264  ;;  %p2717_p5 = pmov %p2716_p0 }
 0x151   : > { %p2718_p9 = pmov %p2716_p0 }
 0x152   : > { %2022 = dma.done.wait (%p2717_p5), [#allocation13], 2064  }
 0x153   : > { %2024 = vsyncadd (%p2718_p9), [#allocation13], 4294965232  ;;  %p2719_p3 = pmov %p2716_p0 }
 0x154   : > { %p2720_p8 = pmov %p2716_p0 }
 0x155   : > { %2026 = dma.done.wait (%p2719_p3), [#allocation16], 32  }
 0x156   : > { %2028 = vsyncadd (%p2720_p8), [#allocation16], 4294967264  ;;  %p2721_p2 = pmov %p2716_p0 }
 0x157   : > { %p2722_p7 = pmov %p2716_p0 }
 0x158   : > { %2030 = dma.done.wait (%p2721_p2), [#allocation19], 2064  }
 0x159   : > { %2032 = vsyncadd (%p2722_p7), [#allocation19], 4294965232  ;;  %p681_p1 = scmp.lt.s32.totalorder %s2714_s15, 3  ;;  %s2723_s29 = sld [smem:[#allocation35_spill]] }
 0x15a   : > { %p2724_p13 = scmp.ne.s32.totalorder %s2714_s15, 0 }
 0x15b   : > { %s2531_s23 = scalar_select %p681_p1, %s2714_s15, 3 }
 0x15c   : > { %688 = sbr.rel (%p2724_p13) target bundleno = 357 (0x165), region = 128  ;;  %s2725_s21 = sld [smem:[#allocation33_spill]] (!%p2724_p13)  ;;  %v2066_v2 = vmov (!%p2724_p13), 0.0  }
 0x15d   : > { %693 = vst [vmem:[#allocation21] sm:$0x3] (!%p2724_p13), %v2066_v2 }
 0x15f   : > { %s683_s28 = scalar_lea.vmem %s2723_s29, %s2531_s23 }
 0x162   : > { %s2726_s4 = smov (!%p2724_p13), %s2725_s21  ;;  %v689_v0 = vld [vmem:[%s2725_s21] sm:$0xff] (!%p2724_p13) }
 0x163   : > { %v690_v1 = vld [vmem:[%s2726_s4 + $0x8] sm:$0xff]  ;;  %691 = vst [vmem:[#allocation2] sm:$0xff] %v689_v0 }
 0x164   : > { %692 = vst [vmem:[#allocation2 + $0x8] sm:$0xff] %v690_v1 }
 0x165 PF: > { %v752_v3 = vld [vmem:[%s2500_s26] sm:$0xff]  ;;  %v753_v4 = vld [vmem:[%s2500_s26 + $0x8] sm:$0xff]  ;;  %v754_v5 = vld [vmem:[%s2500_s26 + $0x10] sm:$0xff]  ;;  %v2067_v6 = vmov 0.0   ;;  %vm2068_vm0 = vmmov 0   ;;  %s2727_s3 = sld [smem:[#allocation34_spill]] }
 0x166   : > { %1426 = vmatprep.subr.bf16.mxu0 %v2067_v6  ;;  %v769_v7 = vpack.c.bf16 %v753_v4, %v752_v3  ;;  %v755_v8 = vld [vmem:[%s2500_s26 + $0x18] sm:$0xff]  ;;  %1442 = vmatprep.mubr.msk.bf16.mxu0 %vm2068_vm0, %v2067_v6  ;;  %v756_v10 = vld [vmem:[%s2500_s26 + $0x20] sm:$0xff]  ;;  %v757_v11 = vld [vmem:[%s2500_s26 + $0x28] sm:$0xff]  ;;  %vm832_vm1 = vcmask 130048   ;;  %s2729_s6 = sld [smem:[#allocation30_spill]] }
 0x167   : > { %1446 = vmatprep.subr.bf16.mxu1 %v2067_v6  ;;  %1448 = vmatprep.mubr.msk.bf16.mxu1 %vm2068_vm0, %v2067_v6  ;;  %v770_v9 = vpack.c.bf16 %v755_v8, %v754_v5  ;;  %v771_v15 = vpack.c.bf16 %v757_v11, %v756_v10  ;;  %v758_v16 = vld [vmem:[%s2500_s26 + $0x30] sm:$0xff]  ;;  %v759_v17 = vld [vmem:[%s2500_s26 + $0x38] sm:$0xff]  ;;  %v760_v21 = vld [vmem:[%s2500_s26 + $0x40] sm:$0xff] }
 0x168   : > { %1427 = vmatpush3.bf16.msra.mxu0 %v769_v7  ;;  %v772_v20 = vpack.c.bf16 %v759_v17, %v758_v16  ;;  %v761_v22 = vld [vmem:[%s2500_s26 + $0x48] sm:$0xff]  ;;  %v762_v26 = vld [vmem:[%s2500_s26 + $0x50] sm:$0xff]  ;;  %v763_v27 = vld [vmem:[%s2500_s26 + $0x58] sm:$0xff] }
 0x169   : > { %1428 = vmatprep.subr.bf16.mxu0 %v2067_v6  ;;  %v773_v25 = vpack.c.bf16 %v761_v22, %v760_v21  ;;  %v774_v30 = vpack.c.bf16 %v763_v27, %v762_v26  ;;  %v764_v31 = vld [vmem:[%s2500_s26 + $0x60] sm:$0xff]  ;;  %v765_v32 = vld [vmem:[%s2500_s26 + $0x68] sm:$0xff]  ;;  %v766_v37 = vld [vmem:[%s2500_s26 + $0x70] sm:$0xff] }
 0x16a   : > { %v775_v36 = vpack.c.bf16 %v765_v32, %v764_v31  ;;  %v767_v38 = vld [vmem:[%s2500_s26 + $0x78] sm:$0xff]  ;;  %v1377_v52 = vld [vmem:[%s588_s25] ss:$0 sm:$0xff] }
 0x16b   : > { %v704_v13 = vld [vmem:[#allocation2 + $0x8] sm:$0xff]  ;;  %v776_v42 = vpack.c.bf16 %v767_v38, %v766_v37  ;;  %v1378_v55 = vld [vmem:[%s596_s9] ss:$0 sm:$0xff] }
 0x16c   : > { %v703_v12 = vld [vmem:[#allocation2] sm:$0xff]  ;;  %1429 = vmatpush3.bf16.msra.mxu0 %v770_v9  ;;  %v1642_v2 = vld [vmem:[%s2727_s3] sm:$0xff]   ;;  %p1382_p10 = scmp.ne.s32.totalorder %s2729_s6, 3 }
 0x16d   : > { %v710_v14 = vadd.f32 %v704_v13, %v703_v12  ;;  %1430 = vmatprep.subr.bf16.mxu0 %v2067_v6  ;;  %v1379_v3 = vld [vmem:[%s683_s28] ss:$0 sm:$0xff]  ;;  %s2730_s11 = sld [smem:[#allocation37_spill]] (!%p1382_p10)  ;;  %vm2070_vm2 = vmmov (!%p1382_p10), 0   ;;  %v973_v17 = vld [vmem:[#allocation12 + $0x8] sm:$0xff] (!%p1382_p10)  ;;  %v979_v26 = vld [vmem:[#allocation12 + $0x38] sm:$0xff] (!%p1382_p10) }
 0x16e   : > { %v972_v16 = vld [vmem:[#allocation12] sm:$0xff] (!%p1382_p10)  ;;  %v982_v31 = vld [vmem:[#allocation12 + $0x50] sm:$0xff] (!%p1382_p10)  ;;  %v983_v32 = vld [vmem:[#allocation12 + $0x58] sm:$0xff] (!%p1382_p10)  ;;  %vm935_vm3 = vcmask (!%p1382_p10), 1041408  }
 0x16f   : > { %v711_v18 = vrot.slane %v710_v14, 4  ;;  %v976_v22 = vld [vmem:[#allocation12 + $0x20] sm:$0xff] (!%p1382_p10)  ;;  %v986_v37 = vld [vmem:[#allocation12 + $0x70] sm:$0xff] (!%p1382_p10)  ;;  %v987_v38 = vld [vmem:[#allocation12 + $0x78] sm:$0xff] (!%p1382_p10) }
 0x170   : > { %1431 = vmatpush3.bf16.msra.mxu0 %v771_v15 }
 0x171   : > { %v712_v19 = vadd.f32 %v711_v18, %v710_v14  ;;  %1432 = vmatprep.subr.bf16.mxu0 %v2067_v6  ;;  %v2069_v14 = vmov (!%p1382_p10), 0.0   ;;  %v989_v18 = vpack.c.bf16 (!%p1382_p10), %v973_v17, %v972_v16  ;;  %v1088_v16 = vld [vmem:[#allocation18 + $0x30] sm:$0xff] (!%p1382_p10)  ;;  %v1089_v17 = vld [vmem:[#allocation18 + $0x38] sm:$0xff] (!%p1382_p10) }
 0x173   : > { %v713_v23 = vrot.slane %v712_v19, 2 }
 0x174   : > { %1433 = vmatpush3.bf16.msra.mxu0 %v772_v20  ;;  %v975_v20 = vld [vmem:[#allocation12 + $0x18] sm:$0xff] (!%p1382_p10) }
 0x175   : > { %v714_v24 = vadd.f32 %v713_v23, %v712_v19  ;;  %1434 = vmatprep.subr.bf16.mxu0 %v2067_v6  ;;  %v974_v19 = vld [vmem:[#allocation12 + $0x10] sm:$0xff] (!%p1382_p10)  ;;  %v977_v23 = vld [vmem:[#allocation12 + $0x28] sm:$0xff] (!%p1382_p10) }
 0x176   : > { %v990_v21 = vpack.c.bf16 (!%p1382_p10), %v975_v20, %v974_v19  ;;  %v1090_v19 = vld [vmem:[#allocation18 + $0x40] sm:$0xff] (!%p1382_p10)  ;;  %v1091_v20 = vld [vmem:[#allocation18 + $0x48] sm:$0xff] (!%p1382_p10) }
 0x177   : > { %v715_v28 = vrot.slane %v714_v24, 1 }
 0x178   : > { %1435 = vmatpush3.bf16.msra.mxu0 %v773_v25  ;;  %v978_v25 = vld [vmem:[#allocation12 + $0x30] sm:$0xff] (!%p1382_p10) }
 0x179   : > { %v716_v29 = vadd.f32 %v715_v28, %v714_v24  ;;  %1436 = vmatprep.subr.bf16.mxu0 %v2067_v6  ;;  %v991_v24 = vpack.c.bf16 (!%p1382_p10), %v977_v23, %v976_v22  ;;  %v992_v27 = vpack.c.bf16 (!%p1382_p10), %v979_v26, %v978_v25  ;;  %v980_v28 = vld [vmem:[#allocation12 + $0x40] sm:$0xff] (!%p1382_p10)  ;;  %v1092_v22 = vld [vmem:[#allocation18 + $0x50] sm:$0xff] (!%p1382_p10)  ;;  %v1095_v26 = vld [vmem:[#allocation18 + $0x68] sm:$0xff] (!%p1382_p10) }
 0x17a   : > { %v1093_v23 = vld [vmem:[#allocation18 + $0x58] sm:$0xff] (!%p1382_p10)  ;;  %v1094_v25 = vld [vmem:[#allocation18 + $0x60] sm:$0xff] (!%p1382_p10) }
 0x17b   : > { %v717_v33 = vmul.f32 0.0625, %v716_v29  ;;  %v981_v29 = vld [vmem:[#allocation12 + $0x48] sm:$0xff] (!%p1382_p10) }
 0x17c   : > { %1437 = vmatpush3.bf16.msra.mxu0 %v774_v30  ;;  %v993_v30 = vpack.c.bf16 (!%p1382_p10), %v981_v29, %v980_v28  ;;  %v1096_v28 = vld [vmem:[#allocation18 + $0x70] sm:$0xff] (!%p1382_p10)  ;;  %v1097_v29 = vld [vmem:[#allocation18 + $0x78] sm:$0xff] (!%p1382_p10) }
 0x17d   : > { %v718_v34 = vsub.f32 %v703_v12, %v717_v33  ;;  %v719_v35 = vsub.f32 %v704_v13, %v717_v33  ;;  %1438 = vmatprep.subr.bf16.mxu0 %v2067_v6  ;;  %v887_v13 = vld [vmem:[%s2730_s11] sm:$0x3] (!%p1382_p10)  ;;  %v994_v33 = vpack.c.bf16 (!%p1382_p10), %v983_v32, %v982_v31 }
 0x17e   : > { %v888_v15 = vpack.c.bf16 (!%p1382_p10), %v887_v13, %v887_v13  ;;  %v1087_v13 = vld [vmem:[#allocation18 + $0x28] sm:$0xff] (!%p1382_p10)  ;;  %v1386_v31 = vld [vmem:[#allocation14] ss:$0 sm:$0xff] (!%p1382_p10) }
 0x17f   : > { %v720_v39 = vmul.f32 %v718_v34, %v718_v34  ;;  %v721_v40 = vmul.f32 %v719_v35, %v719_v35 }
 0x180   : > { %1439 = vmatpush3.bf16.msra.mxu0 %v775_v36 }
 0x181   : > { %v724_v41 = vadd.f32 %v721_v40, %v720_v39  ;;  %1440 = vmatprep.subr.bf16.mxu0 %v2067_v6  ;;  %v996_v39 = vpack.c.bf16 (!%p1382_p10), %v987_v38, %v986_v37 }
 0x183   : > { %v725_v43 = vrot.slane %v724_v41, 4 }
 0x184   : > { %1441 = vmatpush3.bf16.msra.mxu0 %v776_v42 }
 0x185   : > { %v726_v44 = vadd.f32 %v725_v43, %v724_v41  ;;  %1452 = vmatprep.subr.bf16.mxu0 (!%p1382_p10), %v2069_v14 }
 0x187   : > { %v727_v45 = vrot.slane %v726_v44, 2 }
 0x189   : > { %v728_v46 = vadd.f32 %v727_v45, %v726_v44 }
 0x18b   : > { %v729_v47 = vrot.slane %v728_v46, 1 }
 0x18d   : > { %v730_v48 = vadd.f32 %v729_v47, %v728_v46 }
 0x18f   : > { %v731_v49 = vmul.f32 0.0625, %v730_v48 }
 0x191   : > { %v732_v50 = vadd.f32 1e-05, %v731_v49 }
 0x193   : > { %1643 = vrsqrt.f32 %v732_v50 }
 0x19d   : > { %v1644_v51 = vpop.eup %1643 }
 0x19e   : > { %v734_v53 = vmul.f32 %v1644_v51, %v718_v34  ;;  %v735_v54 = vmul.f32 %v1644_v51, %v719_v35  ;;  %v984_v34 = vld [vmem:[#allocation12 + $0x60] sm:$0xff] (!%p1382_p10)  ;;  %v985_v35 = vld [vmem:[#allocation12 + $0x68] sm:$0xff] (!%p1382_p10) }
 0x19f   : > { %v995_v36 = vpack.c.bf16 (!%p1382_p10), %v985_v35, %v984_v34 }
 0x1a0   : > { %v742_v56 = vmul.f32 %v1377_v52, %v734_v53  ;;  %v743_v57 = vmul.f32 %v1377_v52, %v735_v54 }
 0x1a2   : > { %v750_v58 = vadd.f32 %v1378_v55, %v742_v56  ;;  %v751_v59 = vadd.f32 %v1378_v55, %v743_v57 }
 0x1a4   : > { %v768_v60 = vpack.c.bf16 %v751_v59, %v750_v58 }
 0x1a6   : > { %1443 = vmatmul.mubr.bf16.vlgmr.msra.gmra.mrb[0].mxu0 %v768_v60 }
 0x1a7   : > { %1454 = vmatprep.mubr.msk.bf16.mxu0 (!%p1382_p10), %vm2070_vm2, %v2069_v14 }
 0x279   : > { %v811_v61 = vpop.f32.mrb[0].mxu0 }
 0x27a   : > { %v1444_v62 = vpop.f32.mrb[1].mxu0 }
 0x27b   : > { %v814_v63 = vpop.f32.mrb[2].mxu0 }
 0x27c   : > { %v820_v0 = vpack.c.bf16 %v814_v63, %v811_v61  ;;  %v1445_v1 = vpop.f32.mrb[3].mxu0 }
 0x27e   : > { %1447 = vmatpush3.bf16.msra.mxu1 %v820_v0  ;;  %v1384_v0 = vld [vmem:[#allocation9] ss:$0 sm:$0xff] (!%p1382_p10) }
 0x27f   : > { %1458 = vmatprep.subr.bf16.mxu1 (!%p1382_p10), %v2069_v14 }
 0x281   : > { %1449 = vmatmul.mubr.msk.bf16.vlgmr.msra.gmra.mrb[0].mxu1 %vm832_vm1, %v1642_v2  ;;  %v1385_v2 = vld [vmem:[#allocation11] ss:$0 sm:$0xff] (!%p1382_p10) }
 0x282   : > { %1474 = vmatprep.mubr.msk.bf16.mxu1 (!%p1382_p10), %vm2070_vm2, %v2069_v14  ;;  %1459 = vmatpush3.bf16.msra.mxu1 (!%p1382_p10), %v989_v18  ;;  %v1102_v18 = vpack.c.bf16 (!%p1382_p10), %v1089_v17, %v1088_v16 }
 0x283   : > { %1460 = vmatprep.subr.bf16.mxu1 (!%p1382_p10), %v2069_v14 }
 0x286   : > { %1461 = vmatpush3.bf16.msra.mxu1 (!%p1382_p10), %v990_v21  ;;  %v1103_v21 = vpack.c.bf16 (!%p1382_p10), %v1091_v20, %v1090_v19 }
 0x287   : > { %1462 = vmatprep.subr.bf16.mxu1 (!%p1382_p10), %v2069_v14 }
 0x28a   : > { %1463 = vmatpush3.bf16.msra.mxu1 (!%p1382_p10), %v991_v24  ;;  %v1104_v24 = vpack.c.bf16 (!%p1382_p10), %v1093_v23, %v1092_v22 }
 0x28b   : > { %1464 = vmatprep.subr.bf16.mxu1 (!%p1382_p10), %v2069_v14 }
 0x28e   : > { %1465 = vmatpush3.bf16.msra.mxu1 (!%p1382_p10), %v992_v27  ;;  %v1105_v27 = vpack.c.bf16 (!%p1382_p10), %v1095_v26, %v1094_v25 }
 0x28f   : > { %1466 = vmatprep.subr.bf16.mxu1 (!%p1382_p10), %v2069_v14 }
 0x292   : > { %1467 = vmatpush3.bf16.msra.mxu1 (!%p1382_p10), %v993_v30  ;;  %v1106_v30 = vpack.c.bf16 (!%p1382_p10), %v1097_v29, %v1096_v28 }
 0x293   : > { %1468 = vmatprep.subr.bf16.mxu1 (!%p1382_p10), %v2069_v14 }
 0x296   : > { %1469 = vmatpush3.bf16.msra.mxu1 (!%p1382_p10), %v994_v33 }
 0x297   : > { %1470 = vmatprep.subr.bf16.mxu1 (!%p1382_p10), %v2069_v14 }
 0x29a   : > { %1471 = vmatpush3.bf16.msra.mxu1 (!%p1382_p10), %v995_v36 }
 0x29b   : > { %1472 = vmatprep.subr.bf16.mxu1 (!%p1382_p10), %v2069_v14 }
 0x29e   : > { %1473 = vmatpush3.bf16.msra.mxu1 (!%p1382_p10), %v996_v39 }
 0x354   : > { %v870_v4 = vpop.f32.mrb[0].mxu1 }
 0x355   : > { %v871_v5 = vadd.f32 %v1379_v3, %v870_v4  ;;  %v1450_v6 = vpop.f32.mrb[1].mxu1  ;;  %886 = sbr.rel (%p1382_p10) target bundleno = 1934 (0x78e), region = 132 }
 0x356   : > { %v873_v7 = vpop.f32.mrb[2].mxu1  ;;  %v1082_v6 = vld [vmem:[#allocation18] sm:$0xff] (!%p1382_p10) }
 0x357   : > { %v877_v8 = vmax.f32 %v871_v5, 0.0  ;;  %v874_v9 = vadd.f32 %v1379_v3, %v873_v7  ;;  %v1451_v10 = vpop.f32.mrb[3].mxu1  ;;  %v1083_v7 = vld [vmem:[#allocation18 + $0x8] sm:$0xff] (!%p1382_p10) }
 0x358   : > { %v1085_v10 = vld [vmem:[#allocation18 + $0x18] sm:$0xff] (!%p1382_p10) }
 0x359   : > { %881 = vst [vmem:[#allocation2] sm:$0xff] %v877_v8  ;;  %v878_v11 = vmax.f32 %v874_v9, 0.0  ;;  %v1084_v9 = vld [vmem:[#allocation18 + $0x10] sm:$0xff] (!%p1382_p10) }
 0x35b   : > { %882 = vst [vmem:[#allocation2 + $0x8] sm:$0xff] %v878_v11  ;;  %v889_v12 = vpack.c.bf16 (!%p1382_p10), %v878_v11, %v877_v8  ;;  %v1099_v8 = vpack.c.bf16 (!%p1382_p10), %v1083_v7, %v1082_v6  ;;  %v1100_v11 = vpack.c.bf16 (!%p1382_p10), %v1085_v10, %v1084_v9 }
 0x35d   : > { %1453 = vmatpush3.bf16.msra.mxu0 %v889_v12  ;;  %v1086_v12 = vld [vmem:[#allocation18 + $0x20] sm:$0xff] }
 0x35e   : > { %1478 = vmatprep.subr.bf16.mxu0 %v2069_v14 }
 0x360   : > { %1455 = vmatmul.mubr.msk.bf16.vlgmr.msra.gmra.mrb[0].mxu0 %vm832_vm1, %v888_v15  ;;  %v1101_v15 = vpack.c.bf16 %v1087_v13, %v1086_v12 }
 0x361   : > { %1494 = vmatprep.mubr.msk.bf16.mxu0 %vm2070_vm2, %v2069_v14  ;;  %1479 = vmatpush3.bf16.msra.mxu0 %v1099_v8 }
 0x362   : > { %1480 = vmatprep.subr.bf16.mxu0 %v2069_v14 }
 0x365   : > { %1481 = vmatpush3.bf16.msra.mxu0 %v1100_v11 }
 0x366   : > { %1482 = vmatprep.subr.bf16.mxu0 %v2069_v14 }
 0x369   : > { %1483 = vmatpush3.bf16.msra.mxu0 %v1101_v15 }
 0x36a   : > { %1484 = vmatprep.subr.bf16.mxu0 %v2069_v14 }
 0x36d   : > { %1485 = vmatpush3.bf16.msra.mxu0 %v1102_v18 }
 0x36e   : > { %1486 = vmatprep.subr.bf16.mxu0 %v2069_v14 }
 0x371   : > { %1487 = vmatpush3.bf16.msra.mxu0 %v1103_v21 }
 0x372   : > { %1488 = vmatprep.subr.bf16.mxu0 %v2069_v14 }
 0x375   : > { %1489 = vmatpush3.bf16.msra.mxu0 %v1104_v24 }
 0x376   : > { %1490 = vmatprep.subr.bf16.mxu0 %v2069_v14 }
 0x379   : > { %1491 = vmatpush3.bf16.msra.mxu0 %v1105_v27 }
 0x37a   : > { %1492 = vmatprep.subr.bf16.mxu0 %v2069_v14 }
 0x37d   : > { %1493 = vmatpush3.bf16.msra.mxu0 %v1106_v30 }
 0x433   : > { %v927_v40 = vpop.f32.mrb[0].mxu0 }
 0x434   : > { %v936_v41 = vsel %vm935_vm3, %v927_v40, 0.0  ;;  %v1456_v42 = vpop.f32.mrb[1].mxu0 }
 0x435   : > { %v937_v43 = vrot.slane %v936_v41, 4  ;;  %v930_v44 = vpop.f32.mrb[2].mxu0 }
 0x436   : > { %v1457_v45 = vpop.f32.mrb[3].mxu0 }
 0x437   : > { %v938_v46 = vadd.f32 %v937_v43, %v936_v41 }
 0x439   : > { %v939_v47 = vrot.slane %v938_v46, 2 }
 0x43b   : > { %v940_v48 = vadd.f32 %v939_v47, %v938_v46 }
 0x43d   : > { %v941_v49 = vrot.slane %v940_v48, 1 }
 0x43f   : > { %v942_v50 = vadd.f32 %v941_v49, %v940_v48 }
 0x441   : > { %v944_v51 = vmul.f32 0.5, %v942_v50 }
 0x443   : > { %v945_v52 = vsub.f32 %v927_v40, %v944_v51 }
 0x445   : > { %v946_v53 = vmul.f32 %v945_v52, %v945_v52 }
 0x447   : > { %v947_v54 = vsel %vm935_vm3, %v946_v53, 0.0 }
 0x448   : > { %v948_v55 = vrot.slane %v947_v54, 4 }
 0x44a   : > { %v949_v56 = vadd.f32 %v948_v55, %v947_v54 }
 0x44c   : > { %v950_v57 = vrot.slane %v949_v56, 2 }
 0x44e   : > { %v951_v58 = vadd.f32 %v950_v57, %v949_v56  ;;  %v1387_v57 = vld [vmem:[#allocation15] ss:$0 sm:$0xff] }
 0x450   : > { %v952_v59 = vrot.slane %v951_v58, 1 }
 0x452   : > { %v953_v60 = vadd.f32 %v952_v59, %v951_v58  ;;  %v1388_v59 = vld [vmem:[#allocation17] ss:$0 sm:$0xff] }
 0x454   : > { %v954_v61 = vmul.f32 0.5, %v953_v60 }
 0x456   : > { %v955_v62 = vadd.f32 1e-05, %v954_v61 }
 0x458   : > { %1645 = vrsqrt.f32 %v955_v62 }
 0x462   : > { %v1646_v63 = vpop.eup %1645 }
 0x463   : > { %v957_v1 = vmul.f32 %v1646_v63, %v945_v52  ;;  %v1154_v63 = vlaneseq }
 0x465   : > { %v964_v3 = vmul.f32 %v1384_v0, %v957_v1  ;;  %v1155_v0 = vand.u32 127, %v1154_v63  ;;  %v1389_v1 = vld [vmem:[#allocation20] ss:$0 sm:$0xff] }
 0x467   : > { %v971_v4 = vadd.f32 %v1385_v2, %v964_v3  ;;  %vm1156_vm4 = vcmp.lt.s32.totalorder %v1155_v0, 4 }
 0x469   : > { %v988_v5 = vpack.c.bf16 %v971_v4, %v971_v4 }
 0x46b   : > { %1475 = vmatmul.mubr.bf16.vlgmr.msra.gmra.mrb[0].mxu1 %v988_v5 }
 0x53e   : > { %v1038_v32 = vpop.f32.mrb[0].mxu1 }
 0x53f   : > { %v1039_v33 = vadd.f32 %v1386_v31, %v1038_v32  ;;  %v1476_v34 = vpop.f32.mrb[1].mxu1 }
 0x540   : > { %v1041_v35 = vpop.f32.mrb[2].mxu1 }
 0x541   : > { %v1044_v36 = vmax.f32 %v1039_v33, 0.0  ;;  %v1477_v37 = vpop.f32.mrb[3].mxu1 }
 0x543   : > { %v1047_v38 = vsel %vm935_vm3, %v1044_v36, 0.0 }
 0x544   : > { %v1048_v39 = vrot.slane %v1047_v38, 4 }
 0x546   : > { %v1049_v40 = vadd.f32 %v1048_v39, %v1047_v38 }
 0x548   : > { %v1050_v41 = vrot.slane %v1049_v40, 2 }
 0x54a   : > { %v1051_v42 = vadd.f32 %v1050_v41, %v1049_v40 }
 0x54c   : > { %v1052_v43 = vrot.slane %v1051_v42, 1 }
 0x54e   : > { %v1053_v44 = vadd.f32 %v1052_v43, %v1051_v42 }
 0x550   : > { %v1054_v14 = vmul.f32 0.5, %v1053_v44 }
 0x552   : > { %v1055_v45 = vsub.f32 %v1044_v36, %v1054_v14 }
 0x554   : > { %v1056_v46 = vmul.f32 %v1055_v45, %v1055_v45 }
 0x556   : > { %v1057_v47 = vsel %vm935_vm3, %v1056_v46, 0.0 }
 0x557   : > { %v1058_v48 = vrot.slane %v1057_v47, 4 }
 0x559   : > { %v1059_v49 = vadd.f32 %v1058_v48, %v1057_v47 }
 0x55b   : > { %v1060_v50 = vrot.slane %v1059_v49, 2 }
 0x55d   : > { %v1061_v51 = vadd.f32 %v1060_v50, %v1059_v49 }
 0x55f   : > { %v1062_v52 = vrot.slane %v1061_v51, 1 }
 0x561   : > { %v1063_v53 = vadd.f32 %v1062_v52, %v1061_v51 }
 0x563   : > { %v1064_v54 = vmul.f32 0.5, %v1063_v53 }
 0x565   : > { %v1065_v55 = vadd.f32 1e-05, %v1064_v54 }
 0x567   : > { %1647 = vrsqrt.f32 %v1065_v55 }
 0x571   : > { %v1648_v56 = vpop.eup %1647 }
 0x572   : > { %v1067_v58 = vmul.f32 %v1648_v56, %v1055_v45 }
 0x574   : > { %v1074_v60 = vmul.f32 %v1387_v57, %v1067_v58 }
 0x576   : > { %v1081_v61 = vadd.f32 %v1388_v59, %v1074_v60 }
 0x578   : > { %v1098_v62 = vpack.c.bf16 %v1081_v61, %v1081_v61 }
 0x57a   : > { %1495 = vmatmul.mubr.bf16.vlgmr.msra.gmra.mrb[4].mxu0 %v1098_v62 }
 0x64d   : > { %v1148_v2 = vpop.f32.mrb[4].mxu0 }
 0x64e   : > { %v1149_v3 = vadd.f32 %v1389_v1, %v1148_v2  ;;  %v1496_v4 = vpop.f32.mrb[5].mxu0 }
 0x64f   : > { %v1151_v5 = vpop.f32.mrb[6].mxu0 }
 0x650   : > { %v1497_v6 = vpop.f32.mrb[7].mxu0  ;;  %v1157_v7 = vsel %vm1156_vm4, %v1149_v3, -1e+30 }
 0x651   : > { %v1158_v8 = vsel %vm935_vm3, %v1157_v7, -inf }
 0x652   : > { %1159 = vmax.xlane.f32.xlu0 %v1158_v8 }
 0x6df   : > { %v1160_v9 = vpop.xlane.xlu0 %1159 }
 0x6e0   : > { %v1161_v10 = vsub.f32 %v1157_v7, %v1160_v9 }
 0x6e2   : > { %v1162_v11 = vmul.f32 1.442695, %v1161_v10 }
 0x6e4   : > { %1649 = vpow2.f32 %v1162_v11 }
 0x6ee   : > { %v1650_v12 = vpop.eup %1649 }
 0x6ef   : > { %v1164_v13 = vsel %vm935_vm3, %v1650_v12, 0.0 }
 0x6f0   : > { %1165 = vadd.xlane.f32.xlu0 %v1164_v13 }
 0x77d   : > { %v1166_v15 = vpop.xlane.xlu0 %1165 }
 0x77e   : > { %1651 = vlog2.f32 %v1166_v15 }
 0x788   : > { %v1652_v16 = vpop.eup %1651 }
 0x789   : > { %v1168_v17 = vmul.f32 0.6931472, %v1652_v16 }
 0x78b   : > { %v1169_v18 = vsub.f32 %v1161_v10, %v1168_v17 }
 0x78d   : > { %1170 = vst [vmem:[#allocation21] sm:$0x3] %v1169_v18 }
 0x78e PF: > { %s2731_s13 = sld [smem:[#allocation30_spill]]  ;;  %s2071_s25 = smov [#allocation21]  }
 0x78f   : > { %s1178_s9 = sshll.u32 %s2071_s25, 4  ;;  %s1179_s9 = int_to_ptr.vmem [resolvable:$true] %s1178_s9 }
 0x790   : > { %s1967_s23 = scalar_lea.vmem %s1179_s9, 32  ;;  %p1974_p0 = scmp.lt.s32.totalorder %s1179_s9, %s1179_s9 }
 0x791   : > { %p1968_p4 = scmp.ne.s32.totalorder %s1179_s9, %s1967_s23  ;;  %p1975_p5 = scmp.lt.s32.totalorder %s1967_s23, %s1967_s23 }
 0x793   : > { %p1976_p9 = por %p1975_p5, %p1974_p0 }
 0x794   : > { %p1592_p11 = scmp.eq.s32.totalorder %s2731_s13, 3 }
 0x796   : > { %p1969_p6 = pnand %p1968_p4, %p1592_p11 }
 0x798   : > { %p1970_p12 = pneg %p1969_p6 }
 0x79a   : > { %p1977_p3 = pnand %p1976_p9, %p1970_p12 }
 0x79c   : > { %1980 = shalt.err (!%p1977_p3)
}
 0x79d   : > { %s2732_s29 = sld [smem:[#allocation42_spill]] }
 0x7a3   : > { %s1981_s28 = scalar_lea.hbm %s2732_s29, 32 }
 0x7a4   : > { %p1982_p8 = scmp.ne.s32.totalorder %s2732_s29, %s1981_s28  ;;  %p1987_p1 = scmp.lt.u32.totalorder %s1981_s28, %s2732_s29 }
 0x7a6   : > { %p1983_p2 = pnand %p1982_p8, %p1592_p11 }
 0x7a8   : > { %p1984_p7 = pneg %p1983_p2 }
 0x7aa   : > { %p1989_p13 = pnand %p1987_p1, %p1984_p7 }
 0x7ac   : > { %1992 = shalt.err (!%p1989_p13)
}
 0x7ad   : > { %1537 = dma.vmem_to_hbm [thread:$0]  (%p1592_p11), %s1179_s9, 32, %s2732_s29, [#allocation5]  }
 0x7ae   : > { %2034 = dma.done.wait (%p1592_p11), [#allocation5], 32  }
 0x7af   : > { %2036 = vsyncadd (%p1592_p11), [#allocation5], 4294967264 }
 0x7b0 PF: > { %s2733_s21 = sld [smem:[#allocation31_spill]]  ;;  %s2734_s22 = sld [smem:[#allocation29_spill]] }
 0x7b1   : > { %s2735_s20 = sld [smem:[#allocation32_spill]]  ;;  %s2736_s18 = smov %s2043_s19 }
 0x7b6   : > { %p33_p10 = scmp.ge.s32.totalorder %s2733_s21, 6   ;;  %s2737_s19 = smov %s2734_s22 }
 0x7b8   :  { %35 = sbr.rel (!%p33_p10) target bundleno = 21 (0x15), region = 184 }
 0x7bf   :  { %1191 = vsyncpa [#allocation4], 1 }
 0x7c0   :  { %1193 = vsyncpa [#allocation4 + $0x1], 1 }
 0x7c1   :  { %1194 = vsyncpa [#allocation7], 1 }
 0x7c2   :  { %1196 = vsyncpa [#allocation7 + $0x1], 1 }
 0x7c3   :  { %1197 = vsyncpa [#allocation10], 1 }
 0x7c4   :  { %1198 = vsyncpa [#allocation13], 1 }
 0x7c5   :  { %1199 = vsyncpa [#allocation16], 1 }
 0x7c6   :  { %1200 = vsyncpa [#allocation19], 1 }
 0x7c7   :  { %1201 = vsyncpa [#allocation5], 1 }
 0x7c8   :  { %1203 = vsyncpa [#allocation5 + $0x1], 1 }

</bundles_post_ra>
